<compile_context>
chip_gen: v6e
topology: v6e:2x2x1
jax: 0.10.0
libtpu: 0.0.40
codegen_flags: <defaults>
</compile_context>

<pallas_src>
import numpy as np
import jax
import jax.numpy as jnp
from jax import lax
from jax.experimental import pallas as pl
from jax.experimental.pallas import tpu as pltpu

_BN_EPS = 1e-5
_DOT_DTYPE = jnp.bfloat16          # MXU operand dtype (accumulation stays f32)
_ACT_DTYPE = jnp.bfloat16          # activation dtype in HBM (kernel I/O)


# ---------------------------------------------------------------------------
# Fused kernel: conv1 -> grouped conv2 -> pool -> conv3 (+shortcut) -> SE gate
# -> residual ReLU, in one pass.  Grid = (batch tiles, L tiles); the output
# block is VMEM-resident across the L axis so the SE gate + final ReLU are
# applied in place on the last L-tile.
# ---------------------------------------------------------------------------
def _fused_kernel_factory(*, stride, has_shortcut, pool, l2_total):
    f32 = jnp.float32

    def kernel(x_ref, xr_ref,
               w1_ref, b1_ref, w2_ref, b2_ref, w3_ref, b3_ref,
               wse1_ref, bse1_ref, wse2_ref, bse2_ref, *rest):
        if has_shortcut:
            wsc_ref, bsc_ref, o_ref, sums_ref, hcarry_ref = rest
        else:
            o_ref, sums_ref, hcarry_ref = rest

        l_idx = pl.program_id(1)
        n_l = pl.num_programs(1)

        tb, t_in, cin = x_ref.shape
        mid = w1_ref.shape[1]
        cout = w3_ref.shape[1]
        t_out = t_in // stride
        m = tb * t_in
        dt = w1_ref.dtype

        x = x_ref[...]                                     # (tb, t_in, cin) bf16

        # ---- conv1: 1x1 + folded BN + ReLU.  One MXU matmul; the 8-row
        # look-ahead halo block is stacked onto the same dot instead of its
        # own sub-1%-occupancy matmul. -----------------------------------------
        x_all = jnp.concatenate(
            [x.reshape(m, cin), xr_ref[...].reshape(tb * 8, cin)], axis=0)
        h_all = jnp.maximum(
            jnp.dot(x_all.astype(dt), w1_ref[...], preferred_element_type=f32)
            + b1_ref[...], 0.0)                            # (m + 8*tb, mid) f32
        h2 = h_all[:m]                                     # (m, mid)
        h3 = h2.reshape(tb, t_in, mid)
        h_halo = h_all[m:].reshape(tb, 8, mid)
        # Right halo: conv1 of the first row of the next L-tile (zero past the
        # sequence end == conv2's zero padding of its input).
        h_next = jnp.where(l_idx < n_l - 1, h_halo[:, 0:1, :], 0.0)
        # Left halo: last conv1 row of the previous L-tile, carried in a VMEM
        # scratch (the L axis is sequential).  jnp.where (not a multiply) so
        # uninitialized scratch cannot leak NaNs at the sequence start.
        h_prev = jnp.where(l_idx > 0, hcarry_ref[...].reshape(tb, 1, mid), 0.0)
        hcarry_ref[...] = h3[:, t_in - 1, :]

        # ---- conv2: k=3, pad=1, grouped + folded BN + ReLU --------------------
        # Shifted views via XLU sublane rotations + single-row boundary patch.
        row = lax.broadcasted_iota(jnp.int32, (1, t_in, 1), 1)
        h_lft = jnp.where(row == 0, h_prev,
                          pltpu.roll(h2, 1, 0).reshape(tb, t_in, mid))
        h_rgt = jnp.where(row == t_in - 1, h_next,
                          pltpu.roll(h2, m - 1, 0).reshape(tb, t_in, mid))
        w2v = w2_ref[...]
        if w2v.ndim == 2:
            # channels/group == 1 -> depthwise: pure VPU multiply-adds.
            # TODO(synk): pack 2-4 time steps into the lane dim so this path
            #             uses more than `mid` of the 128 lanes.
            out2 = (h_lft * w2v[0][None, None, :]
                    + h3 * w2v[1][None, None, :]
                    + h_rgt * w2v[2][None, None, :]) + b2_ref[...]
        else:
            # TODO(synk): channels/group > 1 keeps dense block-diag matmuls.
            out2 = (jnp.dot(h_lft.reshape(m, mid).astype(dt), w2v[0],
                            preferred_element_type=f32)
                    + jnp.dot(h2.astype(dt), w2v[1], preferred_element_type=f32)
                    + jnp.dot(h_rgt.reshape(m, mid).astype(dt), w2v[2],
                              preferred_element_type=f32)
                    ).reshape(tb, t_in, mid) + b2_ref[...]
        out2 = jnp.maximum(out2, 0.0)

        # ---- pool (MaxPool1d / AvgPool1d, kernel == stride) -------------------
        if stride > 1:
            o4 = out2.reshape(tb * t_out, stride, mid)
            out2p = jnp.max(o4, axis=1) if pool == "max" else jnp.mean(o4, axis=1)
        else:
            out2p = out2.reshape(tb * t_out, mid)

        # ---- conv3: 1x1 + folded BN (no activation) ---------------------------
        s3 = (jnp.dot(out2p.astype(dt), w3_ref[...], preferred_element_type=f32)
              + b3_ref[...]).reshape(tb, t_out, cout)

        # ---- SE phase 1: accumulate per-batch channel sums across L-tiles -----
        @pl.when(l_idx == 0)
        def _init():
            sums_ref[...] = jnp.zeros_like(sums_ref)

        sums_ref[...] += jnp.sum(s3, axis=1)

        # ---- shortcut / residual (pre-SE-gate, pre-ReLU) ----------------------
        if has_shortcut:
            xf = x.astype(f32)
            if stride > 1:
                xs = xf.reshape(tb * t_out, stride, cin).mean(axis=1)  # AvgPool1d
            else:
                xs = xf.reshape(tb * t_out, cin)
            xsc = (jnp.dot(xs.astype(dt), wsc_ref[...],
                           preferred_element_type=f32)
                   + bsc_ref[...]).reshape(tb, t_out, cout)
            pre = s3 + xsc
        else:
            pre = s3 + x.astype(f32)        # identity: stride == 1, cin == cout

        # Output block spans the whole L extent and stays VMEM-resident across
        # the (sequential) L axis; write this tile's rows into it.  HBM
        # writeback happens once per batch tile.
        start = pl.multiple_of(l_idx * t_out, 8)
        o_ref[:, pl.ds(start, t_out), :] = pre.astype(o_ref.dtype)

        # ---- SE finalize + residual ReLU, in place on the last L-tile ---------
        @pl.when(l_idx == n_l - 1)
        def _finalize():
            mean = sums_ref[...] * (1.0 / l2_total)                   # (tb, cout)
            r = jnp.maximum(
                jnp.dot(mean, wse1_ref[...], preferred_element_type=f32)
                + bse1_ref[...], 0.0)
            sig = jax.nn.sigmoid(
                jnp.dot(r, wse2_ref[...], preferred_element_type=f32)
                + bse2_ref[...])                                      # (tb, cout)
            full = o_ref[...].astype(f32) + sig[:, None, :]
            o_ref[...] = jnp.maximum(full, 0.0).astype(o_ref.dtype)

    return kernel


# ---------------------------------------------------------------------------
# Tile sizing (VMEM-capacity aware; re-derives the budget for v7x's 64 MiB).
# ---------------------------------------------------------------------------
def _vmem_capacity_bytes():
    try:
        info = pltpu.get_tpu_info()
        cap = getattr(info, "vmem_capacity_bytes", None)
        if cap:
            return int(cap)
    except Exception:
        pass
    return 128 * 1024 * 1024          # v5e/v6e default


def _pick_tiles(B, L, cin, mid, cout, stride, budget_bytes, *, m_target=512):
    """Pick (b_tile, l_tile): VMEM fits, matmul M feeds the MXU, n_b >= 2."""
    unit = 8 * stride
    l2 = L // stride

    def vmem_est(bt, lt):
        t_out = lt // stride
        return int(2 * bt * lt * cin * 2         # x blocks (bf16, double-buffered)
                   + 2 * bt * 8 * cin * 2        # look-ahead halo blocks
                   + 2 * bt * l2 * cout * 2      # VMEM-resident output block
                   + 8 * bt * lt * mid * 4       # f32 conv1/conv2 intermediates
                   + bt * lt * cin * 4           # f32 upcast of x (residual path)
                   + 3 * bt * t_out * cout * 4)  # s3 / shortcut / pre in f32

    # Batch tile: >= 2 grid steps on the 'parallel' axis (v7x megacore).
    bt = B // 2 if (B % 2 == 0 and B >= 2) else B
    while bt > 1 and vmem_est(bt, unit) > budget_bytes:
        nb = B // bt + 1
        while B % nb:
            nb += 1
        bt = B // nb

    # L tile: largest divisor of L that is a multiple of `unit`, fits the
    # budget, and gives matmul M = bt * lt comfortably >= m_target.
    best = None
    lt = unit
    while lt <= L:
        if L % lt == 0 and vmem_est(bt, lt) <= budget_bytes:
            best = lt
            if bt * lt >= 4 * m_target:
                break
        lt += unit
    if best is None:
        best = unit
    return bt, best


# ---------------------------------------------------------------------------
# Wrapper: one SENextBottleneck forward, channels-last (B, L, Cin) -> bf16.
# ---------------------------------------------------------------------------
def se_next_bottleneck(x, params, *, stride=1, has_shortcut=False, pool="max",
                       b_tile=None, l_tile=None):
    """SENextBottleneck forward: (B, L, Cin) -> (B, L // stride, Cout)."""
    B, L, cin = x.shape
    mid = params["w1"].shape[1]
    cout = params["w3"].shape[1]

    assert pool in ("max", "avg")
    assert L % (8 * stride) == 0, "L must be a multiple of 8*stride"
    if not has_shortcut:
        assert stride == 1 and cin == cout, "identity residual needs matching shapes"

    l2 = L // stride
    x = x.astype(_ACT_DTYPE)          # bf16 activations in HBM

    cap = _vmem_capacity_bytes()
    vmem_limit = min(int(0.75 * cap), 96 * 1024 * 1024)
    auto_bt, auto_lt = _pick_tiles(B, L, cin, mid, cout, stride,
                                   int(0.6 * vmem_limit))
    if b_tile is None:
        b_tile = auto_bt
    if l_tile is None:
        l_tile = auto_lt
    assert B % b_tile == 0
    assert L % l_tile == 0 and l_tile % (8 * stride) == 0

    t_out = l_tile // stride
    n_b, n_l = B // b_tile, L // l_tile
    ht = l_tile // 8
    n_hblk = L // 8

    names = ["w1", "b1", "w2", "b2", "w3", "b3", "wse1", "bse1", "wse2", "bse2"]
    if has_shortcut:
        names += ["wsc", "bsc"]
    weights = [params[n] for n in names]

    def _const_spec(a):
        nd = a.ndim
        return pl.BlockSpec(a.shape, lambda b, l, nd=nd: (0,) * nd)

    in_specs = [
        pl.BlockSpec((b_tile, l_tile, cin), lambda b, l: (b, l, 0)),
        # 8-row-aligned look-ahead halo: the first rows of the next L-tile
        # (clamped at the sequence end; masked in-kernel).
        pl.BlockSpec((b_tile, 8, cin),
                     lambda b, l: (b, jnp.minimum((l + 1) * ht, n_hblk - 1), 0)),
    ] + [_const_spec(a) for a in weights]
    # NOTE: weights are tiny here, so default double-buffering of their
    # constant-index blocks costs only a few KiB of VMEM.

    out_specs = pl.BlockSpec((b_tile, l2, cout), lambda b, l: (b, 0, 0))
    out_shape = jax.ShapeDtypeStruct((B, l2, cout), _ACT_DTYPE)
    # TODO(synk): for very long sequences the VMEM-resident (b_tile, l2, cout)
    #             output block should fall back to a two-pass SE scheme.

    flops = (2 * B * L * cin * mid                  # conv1
             + 8 * B * L * mid                      # depthwise conv2 + relu
             + 2 * B * l2 * mid * cout              # conv3
             + (2 * B * l2 * cin * cout if has_shortcut else 0)
             + 4 * B * cout * max(1, cout // 16))   # SE
    bytes_accessed = (B * L * cin * 2 + B * l2 * cout * 2
                      + sum(int(np.prod(a.shape)) * a.dtype.itemsize
                            for a in weights))

    kernel = _fused_kernel_factory(stride=stride, has_shortcut=has_shortcut,
                                   pool=pool, l2_total=l2)
    out = pl.pallas_call(
        kernel,
        grid=(n_b, n_l),
        in_specs=in_specs,
        out_specs=out_specs,
        out_shape=out_shape,
        scratch_shapes=[pltpu.VMEM((b_tile, cout), jnp.float32),   # SE channel sums
                        pltpu.VMEM((b_tile, mid), jnp.float32)],   # conv1 halo carry
        compiler_params=pltpu.CompilerParams(
            dimension_semantics=("parallel", "arbitrary"),
            vmem_limit_bytes=int(vmem_limit)),
        cost_estimate=pl.CostEstimate(flops=int(flops),
                                      transcendentals=int(B * cout),
                                      bytes_accessed=int(bytes_accessed)),
    )(x, x, *weights)
    return out


# ---------------------------------------------------------------------------
# Deterministic parameter init (BatchNorm folded into conv weights / biases).
# ---------------------------------------------------------------------------
def _bn_fold(key, cout):
    kg, kb, km, kv = jax.random.split(key, 4)
    gamma = 1.0 + 0.1 * jax.random.normal(kg, (cout,), jnp.float32)
    beta = 0.1 * jax.random.normal(kb, (cout,), jnp.float32)
    mean = 0.1 * jax.random.normal(km, (cout,), jnp.float32)
    var = 1.0 + 0.1 * jax.random.uniform(kv, (cout,), jnp.float32)
    scale = gamma / jnp.sqrt(var + _BN_EPS)
    shift = beta - mean * scale
    return scale, shift


def _init_convbr_k1(key, cin, cout):
    kw, kbn = jax.random.split(key)
    W = 0.1 * jax.random.normal(kw, (cout, cin), jnp.float32)        # (out, in)
    scale, shift = _bn_fold(kbn, cout)
    w_eff = (W * scale[:, None]).T.astype(_DOT_DTYPE)                # (cin, cout)
    return w_eff, shift.reshape(1, cout)


def _init_convbr_k3_grouped(key, channels, groups):
    cg = channels // groups
    kw, kbn = jax.random.split(key)
    W = 0.1 * jax.random.normal(kw, (channels, cg, 3), jnp.float32)  # (out, in/g, k)
    scale, shift = _bn_fold(kbn, channels)
    b_eff = shift.reshape(1, channels)
    if cg == 1:
        # Depthwise: per-channel tap vectors (3, channels), f32 (VPU path).
        return (W[:, 0, :] * scale[:, None]).T, b_eff
    # TODO(synk): cg > 1 keeps a dense block-diagonal expansion (MXU path).
    Wn = np.asarray(W * scale[:, None, None])
    dense = np.zeros((3, channels, channels), np.float32)            # (k, in, out)
    for o in range(channels):
        g = o // cg
        for ci in range(cg):
            dense[:, g * cg + ci, o] = Wn[o, ci, :]
    return jnp.asarray(dense, dtype=_DOT_DTYPE), b_eff


def _init_se(key, cout, reduction):
    cred = cout // reduction
    k1, k2, k3, k4 = jax.random.split(key, 4)
    wse1 = (0.1 * jax.random.normal(k1, (cred, cout), jnp.float32)).T   # (cout, cred)
    bse1 = (0.1 * jax.random.normal(k2, (cred,), jnp.float32)).reshape(1, cred)
    wse2 = (0.1 * jax.random.normal(k3, (cout, cred), jnp.float32)).T   # (cred, cout)
    bse2 = (0.1 * jax.random.normal(k4, (cout,), jnp.float32)).reshape(1, cout)
    return wse1, bse1, wse2, bse2


def init_bottleneck(key, cin, cout, *, groups=32, reduction=16, has_shortcut=False):
    mid = cout // 2
    k1, k2, k3, k4, k5 = jax.random.split(key, 5)
    p = {}
    p["w1"], p["b1"] = _init_convbr_k1(k1, cin, mid)
    p["w2"], p["b2"] = _init_convbr_k3_grouped(k2, mid, groups)
    p["w3"], p["b3"] = _init_convbr_k1(k3, mid, cout)
    p["wse1"], p["bse1"], p["wse2"], p["bse2"] = _init_se(k4, cout, reduction)
    if has_shortcut:
        p["wsc"], p["bsc"] = _init_convbr_k1(k5, cin, cout)
    return p


# ---------------------------------------------------------------------------
# Pure-JAX reference (same dtype policy as the kernel: bf16 HBM activations,
# bf16 MXU operands with f32 accumulation, bf16 pre-gate store, bf16 output).
# ---------------------------------------------------------------------------
def bottleneck_reference(x, p, *, stride=1, has_shortcut=False, pool="max"):
    f32 = jnp.float32
    x = x.astype(_ACT_DTYPE)
    B, L, cin = x.shape
    mid = p["w1"].shape[1]
    cout = p["w3"].shape[1]
    l2 = L // stride
    dt = p["w1"].dtype

    h2 = jnp.maximum(jnp.dot(x.reshape(B * L, cin).astype(dt), p["w1"],
                             preferred_element_type=f32) + p["b1"], 0.0)
    h3 = h2.reshape(B, L, mid)

    z = jnp.zeros((B, 1, mid), f32)
    h_lft = jnp.concatenate([z, h3[:, : L - 1, :]], axis=1)
    h_rgt = jnp.concatenate([h3[:, 1:, :], z], axis=1)
    if p["w2"].ndim == 2:
        out2 = (h_lft * p["w2"][0] + h3 * p["w2"][1] + h_rgt * p["w2"][2]) + p["b2"]
    else:
        out2 = (jnp.dot(h_lft.reshape(B * L, mid).astype(dt), p["w2"][0],
                        preferred_element_type=f32)
                + jnp.dot(h2.astype(dt), p["w2"][1], preferred_element_type=f32)
                + jnp.dot(h_rgt.reshape(B * L, mid).astype(dt), p["w2"][2],
                          preferred_element_type=f32)).reshape(B, L, mid) + p["b2"]
    out2 = jnp.maximum(out2, 0.0)

    if stride > 1:
        o4 = out2.reshape(B * l2, stride, mid)
        out2p = jnp.max(o4, axis=1) if pool == "max" else jnp.mean(o4, axis=1)
    else:
        out2p = out2.reshape(B * l2, mid)

    s3 = (jnp.dot(out2p.astype(dt), p["w3"], preferred_element_type=f32)
          + p["b3"]).reshape(B, l2, cout)

    pooled = jnp.mean(s3, axis=1)
    r = jnp.maximum(jnp.dot(pooled, p["wse1"], preferred_element_type=f32)
                    + p["bse1"], 0.0)
    sig = jax.nn.sigmoid(jnp.dot(r, p["wse2"], preferred_element_type=f32)
                         + p["bse2"])

    if has_shortcut:
        if stride > 1:
            xs = x.astype(f32).reshape(B * l2, stride, cin).mean(axis=1)
        else:
            xs = x.astype(f32).reshape(B * l2, cin)
        xsc = (jnp.dot(xs.astype(dt), p["wsc"], preferred_element_type=f32)
               + p["bsc"]).reshape(B, l2, cout)
        pre = s3 + xsc
    else:
        pre = s3 + x.astype(f32)
    # The kernel holds the pre-SE residual sum in its bf16 output buffer.
    pre = pre.astype(jnp.bfloat16).astype(f32)
    return jnp.maximum(pre + sig[:, None, :], 0.0).astype(_ACT_DTYPE)


# ---------------------------------------------------------------------------
if __name__ == "__main__":
    # SENextBottleneck(in=32, out=64, stride=2, groups=32, reduction=16,
    # pool='max', is_shortcut=True) followed by a stride=1 identity-residual
    # block (the module's typical usage), on small deterministic inputs.
    B, CIN, COUT, L = 4, 32, 64, 128

    key = jax.random.PRNGKey(0)
    kx, kp1, kp2 = jax.random.split(key, 3)
    x_ncl = jax.random.normal(kx, (B, CIN, L), jnp.float32)          # PyTorch NCL

    params1 = init_bottleneck(kp1, CIN, COUT, groups=32, reduction=16,
                              has_shortcut=True)
    params2 = init_bottleneck(kp2, COUT, COUT, groups=32, reduction=16,
                              has_shortcut=False)

    x = jnp.transpose(x_ncl, (0, 2, 1))                              # NCL -> NLC
    # Layer 1: explicit small tiles so the multi-L-tile halo / carry /
    # SE-accumulate / in-place-finalize paths are all exercised.
    y1 = se_next_bottleneck(x, params1, stride=2, has_shortcut=True,
                            pool="max", b_tile=2, l_tile=32)
    # Layer 2: stride=1 identity block using the VMEM-aware auto tile picker.
    y2 = se_next_bottleneck(y1, params2, stride=1, has_shortcut=False,
                            pool="max")
    out = jax.block_until_ready(jnp.transpose(y2, (0, 2, 1)))        # NLC -> NCL

    assert out.shape == (B, COUT, L // 2), out.shape
    assert bool(jnp.all(jnp.isfinite(out.astype(jnp.float32))))

    ref1 = bottleneck_reference(x, params1, stride=2, has_shortcut=True, pool="max")
    ref2 = bottleneck_reference(ref1, params2, stride=1, has_shortcut=False, pool="max")
    ref = jax.block_until_ready(jnp.transpose(ref2, (0, 2, 1)))

    np.testing.assert_allclose(np.asarray(y1.astype(jnp.float32)),
                               np.asarray(ref1.astype(jnp.float32)),
                               rtol=2e-2, atol=2e-2)
    np.testing.assert_allclose(np.asarray(out.astype(jnp.float32)),
                               np.asarray(ref.astype(jnp.float32)),
                               rtol=2e-2, atol=2e-2)

    print("KERNEL_OK")
</pallas_src>

<mosaic_0001>
module attributes {stable_mosaic.version = 11 : i64} {
  func.func @kernel(%arg0: i32, %arg1: i32, %arg2: memref<2x32x32xbf16, #tpu.memory_space<vmem>>, %arg3: memref<2x8x32xbf16, #tpu.memory_space<vmem>>, %arg4: memref<32x32xbf16, #tpu.memory_space<vmem>>, %arg5: memref<1x32xf32, #tpu.memory_space<vmem>>, %arg6: memref<3x32xf32, #tpu.memory_space<vmem>>, %arg7: memref<1x32xf32, #tpu.memory_space<vmem>>, %arg8: memref<32x64xbf16, #tpu.memory_space<vmem>>, %arg9: memref<1x64xf32, #tpu.memory_space<vmem>>, %arg10: memref<64x4xf32, #tpu.memory_space<vmem>>, %arg11: memref<1x4xf32, #tpu.memory_space<vmem>>, %arg12: memref<4x64xf32, #tpu.memory_space<vmem>>, %arg13: memref<1x64xf32, #tpu.memory_space<vmem>>, %arg14: memref<32x64xbf16, #tpu.memory_space<vmem>>, %arg15: memref<1x64xf32, #tpu.memory_space<vmem>>, %arg16: memref<2x64x64xbf16, #tpu.memory_space<vmem>>, %arg17: memref<2x64xf32, #tpu.memory_space<vmem>>, %arg18: memref<2x32xf32, #tpu.memory_space<vmem>>) attributes {dimension_semantics = [#tpu.dimension_semantics<parallel>, #tpu.dimension_semantics<arbitrary>], iteration_bounds = array<i64: 2, 4>, scalar_prefetch = 0 : i64, scratch_operands = 2 : i64, tpu.core_type = #tpu.core_type<tc>, window_params = [{transform_indices = @transform_0, window_bounds = array<i64: 2, 32, 32>}, {transform_indices = @transform_1, window_bounds = array<i64: 2, 8, 32>}, {pipeline_mode = #tpu.pipeline_mode<synchronous>, transform_indices = @transform_2, window_bounds = array<i64: 32, 32>}, {pipeline_mode = #tpu.pipeline_mode<synchronous>, transform_indices = @transform_3, window_bounds = array<i64: 1, 32>}, {pipeline_mode = #tpu.pipeline_mode<synchronous>, transform_indices = @transform_4, window_bounds = array<i64: 3, 32>}, {pipeline_mode = #tpu.pipeline_mode<synchronous>, transform_indices = @transform_5, window_bounds = array<i64: 1, 32>}, {pipeline_mode = #tpu.pipeline_mode<synchronous>, transform_indices = @transform_6, window_bounds = array<i64: 32, 64>}, {pipeline_mode = #tpu.pipeline_mode<synchronous>, transform_indices = @transform_7, window_bounds = array<i64: 1, 64>}, {pipeline_mode = #tpu.pipeline_mode<synchronous>, transform_indices = @transform_8, window_bounds = array<i64: 64, 4>}, {pipeline_mode = #tpu.pipeline_mode<synchronous>, transform_indices = @transform_9, window_bounds = array<i64: 1, 4>}, {pipeline_mode = #tpu.pipeline_mode<synchronous>, transform_indices = @transform_10, window_bounds = array<i64: 4, 64>}, {pipeline_mode = #tpu.pipeline_mode<synchronous>, transform_indices = @transform_11, window_bounds = array<i64: 1, 64>}, {pipeline_mode = #tpu.pipeline_mode<synchronous>, transform_indices = @transform_12, window_bounds = array<i64: 32, 64>}, {pipeline_mode = #tpu.pipeline_mode<synchronous>, transform_indices = @transform_13, window_bounds = array<i64: 1, 64>}, {transform_indices = @transform_14, window_bounds = array<i64: 2, 64, 64>}]} {
    %c0 = arith.constant 0 : index
    %c0_0 = arith.constant 0 : index
    %c0_1 = arith.constant 0 : index
    %0 = vector.load %arg2[%c0, %c0_0, %c0_1] : memref<2x32x32xbf16, #tpu.memory_space<vmem>>, vector<2x32x32xbf16>
    %1 = vector.shape_cast %0 : vector<2x32x32xbf16> to vector<64x32xbf16>
    %c0_2 = arith.constant 0 : index
    %c0_3 = arith.constant 0 : index
    %c0_4 = arith.constant 0 : index
    %2 = vector.load %arg3[%c0_2, %c0_3, %c0_4] : memref<2x8x32xbf16, #tpu.memory_space<vmem>>, vector<2x8x32xbf16>
    %3 = vector.shape_cast %2 : vector<2x8x32xbf16> to vector<16x32xbf16>
    %4 = tpu.concatenate %1, %3 in 0 : vector<64x32xbf16>, vector<16x32xbf16> -> vector<80x32xbf16>
    %c0_5 = arith.constant 0 : index
    %c0_6 = arith.constant 0 : index
    %5 = vector.load %arg4[%c0_5, %c0_6] : memref<32x32xbf16, #tpu.memory_space<vmem>>, vector<32x32xbf16>
    %cst = arith.constant dense<0.000000e+00> : vector<80x32xf32>
    %6 = tpu.matmul %4, %5, %cst {dimension_numbers = #tpu.dot_dimension_numbers<[1], [0], [0], [1], [0, 0, 1, 1], [], []>} : vector<80x32xbf16>, vector<32x32xbf16>, vector<80x32xf32> -> vector<80x32xf32>
    %c0_7 = arith.constant 0 : index
    %c0_8 = arith.constant 0 : index
    %7 = vector.load %arg5[%c0_7, %c0_8] : memref<1x32xf32, #tpu.memory_space<vmem>>, vector<1x32xf32>
    %8 = vector.broadcast %7 : vector<1x32xf32> to vector<80x32xf32>
    %9 = arith.addf %6, %8 : vector<80x32xf32>
    %cst_9 = arith.constant 0.000000e+00 : f32
    %10 = vector.broadcast %cst_9 : f32 to vector<80x32xf32>
    %11 = arith.maximumf %9, %10 : vector<80x32xf32>
    %12 = vector.extract_strided_slice %11 {offsets = [0, 0], sizes = [64, 32], strides = [1, 1]} : vector<80x32xf32> to vector<64x32xf32>
    %13 = vector.shape_cast %12 : vector<64x32xf32> to vector<2x32x32xf32>
    %14 = vector.extract_strided_slice %11 {offsets = [64, 0], sizes = [16, 32], strides = [1, 1]} : vector<80x32xf32> to vector<16x32xf32>
    %15 = vector.shape_cast %14 : vector<16x32xf32> to vector<2x8x32xf32>
    %c3_i32 = arith.constant 3 : i32
    %16 = arith.cmpi slt, %arg1, %c3_i32 : i32
    %17 = vector.extract_strided_slice %15 {offsets = [0, 0, 0], sizes = [2, 1, 32], strides = [1, 1, 1]} : vector<2x8x32xf32> to vector<2x1x32xf32>
    %cst_10 = arith.constant 0.000000e+00 : f32
    %18 = vector.broadcast %cst_10 : f32 to vector<2x1x32xf32>
    %19 = arith.select %16, %17, %18 : vector<2x1x32xf32>
    %c0_i32 = arith.constant 0 : i32
    %20 = arith.cmpi sgt, %arg1, %c0_i32 : i32
    %c0_11 = arith.constant 0 : index
    %c0_12 = arith.constant 0 : index
    %21 = vector.load %arg18[%c0_11, %c0_12] : memref<2x32xf32, #tpu.memory_space<vmem>>, vector<2x32xf32>
    %22 = vector.shape_cast %21 : vector<2x32xf32> to vector<2x1x32xf32>
    %cst_13 = arith.constant 0.000000e+00 : f32
    %23 = vector.broadcast %cst_13 : f32 to vector<2x1x32xf32>
    %24 = arith.select %20, %22, %23 : vector<2x1x32xf32>
    %25 = vector.extract_strided_slice %13 {offsets = [0, 31, 0], sizes = [2, 1, 32], strides = [1, 1, 1]} : vector<2x32x32xf32> to vector<2x1x32xf32>
    %26 = vector.shape_cast %25 : vector<2x1x32xf32> to vector<2x32xf32>
    %c0_14 = arith.constant 0 : index
    %c0_15 = arith.constant 0 : index
    %27 = vector.load %arg18[%c0_14, %c0_15] : memref<2x32xf32, #tpu.memory_space<vmem>>, vector<2x32xf32>
    tpu.vector_store %arg18[%c0_14, %c0_15], %26 {strides = array<i32>} : memref<2x32xf32, #tpu.memory_space<vmem>>, vector<2x32xf32>,
    %28 = tpu.iota {dimensions = array<i32: 1>} : vector<1x32x1xi32>
    %c0_i32_16 = arith.constant 0 : i32
    %29 = vector.broadcast %c0_i32_16 : i32 to vector<1x32x1xi32>
    %30 = arith.cmpi eq, %28, %29 : vector<1x32x1xi32>
    %c1_i32 = arith.constant 1 : i32
    %31 = tpu.dynamic_rotate %12 by %c1_i32 dim 0 : vector<64x32xf32>, i32 -> vector<64x32xf32>
    %32 = vector.shape_cast %31 : vector<64x32xf32> to vector<2x32x32xf32>
    %33 = vector.shape_cast %30 : vector<1x32x1xi1> to vector<1x32x1xi1>
    %34 = vector.broadcast %33 : vector<1x32x1xi1> to vector<2x32x32xi1>
    %35 = vector.shape_cast %24 : vector<2x1x32xf32> to vector<2x1x32xf32>
    %36 = vector.broadcast %35 : vector<2x1x32xf32> to vector<2x32x32xf32>
    %37 = arith.select %34, %36, %32 : vector<2x32x32xi1>, vector<2x32x32xf32>
    %c31_i32 = arith.constant 31 : i32
    %38 = vector.broadcast %c31_i32 : i32 to vector<1x32x1xi32>
    %39 = arith.cmpi eq, %28, %38 : vector<1x32x1xi32>
    %c63_i32 = arith.constant 63 : i32
    %40 = tpu.dynamic_rotate %12 by %c63_i32 dim 0 : vector<64x32xf32>, i32 -> vector<64x32xf32>
    %41 = vector.shape_cast %40 : vector<64x32xf32> to vector<2x32x32xf32>
    %42 = vector.shape_cast %39 : vector<1x32x1xi1> to vector<1x32x1xi1>
    %43 = vector.broadcast %42 : vector<1x32x1xi1> to vector<2x32x32xi1>
    %44 = vector.shape_cast %19 : vector<2x1x32xf32> to vector<2x1x32xf32>
    %45 = vector.broadcast %44 : vector<2x1x32xf32> to vector<2x32x32xf32>
    %46 = arith.select %43, %45, %41 : vector<2x32x32xi1>, vector<2x32x32xf32>
    %c0_17 = arith.constant 0 : index
    %c0_18 = arith.constant 0 : index
    %47 = vector.load %arg6[%c0_17, %c0_18] : memref<3x32xf32, #tpu.memory_space<vmem>>, vector<3x32xf32>
    %48 = vector.extract_strided_slice %47 {offsets = [0, 0], sizes = [1, 32], strides = [1, 1]} : vector<3x32xf32> to vector<1x32xf32>
    %49 = vector.shape_cast %48 : vector<1x32xf32> to vector<32xf32>
    %50 = vector.shape_cast %49 : vector<32xf32> to vector<1x1x32xf32>
    %51 = vector.broadcast %50 : vector<1x1x32xf32> to vector<2x32x32xf32>
    %52 = arith.mulf %37, %51 : vector<2x32x32xf32>
    %53 = vector.extract_strided_slice %47 {offsets = [1, 0], sizes = [1, 32], strides = [1, 1]} : vector<3x32xf32> to vector<1x32xf32>
    %54 = vector.shape_cast %53 : vector<1x32xf32> to vector<32xf32>
    %55 = vector.shape_cast %54 : vector<32xf32> to vector<1x1x32xf32>
    %56 = vector.broadcast %55 : vector<1x1x32xf32> to vector<2x32x32xf32>
    %57 = arith.mulf %13, %56 : vector<2x32x32xf32>
    %58 = arith.addf %52, %57 : vector<2x32x32xf32>
    %59 = vector.extract_strided_slice %47 {offsets = [2, 0], sizes = [1, 32], strides = [1, 1]} : vector<3x32xf32> to vector<1x32xf32>
    %60 = vector.shape_cast %59 : vector<1x32xf32> to vector<32xf32>
    %61 = vector.shape_cast %60 : vector<32xf32> to vector<1x1x32xf32>
    %62 = vector.broadcast %61 : vector<1x1x32xf32> to vector<2x32x32xf32>
    %63 = arith.mulf %46, %62 : vector<2x32x32xf32>
    %64 = arith.addf %58, %63 : vector<2x32x32xf32>
    %c0_19 = arith.constant 0 : index
    %c0_20 = arith.constant 0 : index
    %65 = vector.load %arg7[%c0_19, %c0_20] : memref<1x32xf32, #tpu.memory_space<vmem>>, vector<1x32xf32>
    %66 = vector.shape_cast %65 : vector<1x32xf32> to vector<1x1x32xf32>
    %67 = vector.broadcast %66 : vector<1x1x32xf32> to vector<2x32x32xf32>
    %68 = arith.addf %64, %67 : vector<2x32x32xf32>
    %cst_21 = arith.constant 0.000000e+00 : f32
    %69 = vector.broadcast %cst_21 : f32 to vector<2x32x32xf32>
    %70 = arith.maximumf %68, %69 : vector<2x32x32xf32>
    %71 = vector.shape_cast %70 : vector<2x32x32xf32> to vector<32x2x32xf32>
    %cst_22 = arith.constant dense<0xFF800000> : vector<32x32xf32>
    %72 = vector.multi_reduction <maximumf>, %71, %cst_22 [1] : vector<32x2x32xf32> to vector<32x32xf32>
    %73 = arith.truncf %72 : vector<32x32xf32> to vector<32x32xbf16>
    %c0_23 = arith.constant 0 : index
    %c0_24 = arith.constant 0 : index
    %74 = vector.load %arg8[%c0_23, %c0_24] : memref<32x64xbf16, #tpu.memory_space<vmem>>, vector<32x64xbf16>
    %cst_25 = arith.constant dense<0.000000e+00> : vector<32x64xf32>
    %75 = tpu.matmul %73, %74, %cst_25 {dimension_numbers = #tpu.dot_dimension_numbers<[1], [0], [0], [1], [0, 0, 1, 1], [], []>} : vector<32x32xbf16>, vector<32x64xbf16>, vector<32x64xf32> -> vector<32x64xf32>
    %c0_26 = arith.constant 0 : index
    %c0_27 = arith.constant 0 : index
    %76 = vector.load %arg9[%c0_26, %c0_27] : memref<1x64xf32, #tpu.memory_space<vmem>>, vector<1x64xf32>
    %77 = vector.broadcast %76 : vector<1x64xf32> to vector<32x64xf32>
    %78 = arith.addf %75, %77 : vector<32x64xf32>
    %79 = vector.shape_cast %78 : vector<32x64xf32> to vector<2x16x64xf32>
    %c0_i32_28 = arith.constant 0 : i32
    %80 = arith.cmpi eq, %arg1, %c0_i32_28 : i32
    %81 = arith.extui %80 : i1 to i32
    %c0_i32_29 = arith.constant 0 : i32
    %82 = arith.cmpi ne, %81, %c0_i32_29 : i32
    scf.if %82 {
      %cst_46 = arith.constant 0.000000e+00 : f32
      %108 = vector.broadcast %cst_46 : f32 to vector<2x64xf32>
      %c0_47 = arith.constant 0 : index
      %c0_48 = arith.constant 0 : index
      %109 = vector.load %arg17[%c0_47, %c0_48] : memref<2x64xf32, #tpu.memory_space<vmem>>, vector<2x64xf32>
      tpu.vector_store %arg17[%c0_47, %c0_48], %108 {strides = array<i32>} : memref<2x64xf32, #tpu.memory_space<vmem>>, vector<2x64xf32>,
    } else {
    }
    %c0_30 = arith.constant 0 : index
    %c0_31 = arith.constant 0 : index
    %83 = vector.load %arg17[%c0_30, %c0_31] : memref<2x64xf32, #tpu.memory_space<vmem>>, vector<2x64xf32>
    %cst_32 = arith.constant dense<0.000000e+00> : vector<2x64xf32>
    %84 = vector.multi_reduction <add>, %79, %cst_32 [1] : vector<2x16x64xf32> to vector<2x64xf32>
    %85 = arith.addf %83, %84 : vector<2x64xf32>
    %c0_33 = arith.constant 0 : index
    %c0_34 = arith.constant 0 : index
    %86 = vector.load %arg17[%c0_33, %c0_34] : memref<2x64xf32, #tpu.memory_space<vmem>>, vector<2x64xf32>
    tpu.vector_store %arg17[%c0_33, %c0_34], %85 {strides = array<i32>} : memref<2x64xf32, #tpu.memory_space<vmem>>, vector<2x64xf32>,
    %87 = arith.extf %0 : vector<2x32x32xbf16> to vector<2x32x32xf32>
    %88 = vector.shape_cast %87 : vector<2x32x32xf32> to vector<32x2x32xf32>
    %cst_35 = arith.constant dense<0.000000e+00> : vector<32x32xf32>
    %89 = vector.multi_reduction <add>, %88, %cst_35 [1] : vector<32x2x32xf32> to vector<32x32xf32>
    %cst_36 = arith.constant 2.000000e+00 : f32
    %90 = vector.broadcast %cst_36 : f32 to vector<32x32xf32>
    %91 = arith.divf %89, %90 : vector<32x32xf32>
    %92 = arith.truncf %91 : vector<32x32xf32> to vector<32x32xbf16>
    %c0_37 = arith.constant 0 : index
    %c0_38 = arith.constant 0 : index
    %93 = vector.load %arg14[%c0_37, %c0_38] : memref<32x64xbf16, #tpu.memory_space<vmem>>, vector<32x64xbf16>
    %cst_39 = arith.constant dense<0.000000e+00> : vector<32x64xf32>
    %94 = tpu.matmul %92, %93, %cst_39 {dimension_numbers = #tpu.dot_dimension_numbers<[1], [0], [0], [1], [0, 0, 1, 1], [], []>} : vector<32x32xbf16>, vector<32x64xbf16>, vector<32x64xf32> -> vector<32x64xf32>
    %c0_40 = arith.constant 0 : index
    %c0_41 = arith.constant 0 : index
    %95 = vector.load %arg15[%c0_40, %c0_41] : memref<1x64xf32, #tpu.memory_space<vmem>>, vector<1x64xf32>
    %96 = vector.broadcast %95 : vector<1x64xf32> to vector<32x64xf32>
    %97 = arith.addf %94, %96 : vector<32x64xf32>
    %98 = vector.shape_cast %97 : vector<32x64xf32> to vector<2x16x64xf32>
    %99 = arith.addf %79, %98 : vector<2x16x64xf32>
    %c16_i32 = arith.constant 16 : i32
    %100 = arith.muli %arg1, %c16_i32 : i32
    %101 = tpu.assume_multiple %100, 8 : i32
    %102 = arith.truncf %99 : vector<2x16x64xf32> to vector<2x16x64xbf16>
    %c0_42 = arith.constant 0 : index
    %103 = arith.index_cast %101 : i32 to index
    %c0_43 = arith.constant 0 : index
    %104 = vector.load %arg16[%c0_42, %103, %c0_43] : memref<2x64x64xbf16, #tpu.memory_space<vmem>>, vector<2x16x64xbf16>
    tpu.vector_store %arg16[%c0_42, %103, %c0_43], %102 {strides = array<i32>} : memref<2x64x64xbf16, #tpu.memory_space<vmem>>, vector<2x16x64xbf16>,
    %c3_i32_44 = arith.constant 3 : i32
    %105 = arith.cmpi eq, %arg1, %c3_i32_44 : i32
    %106 = arith.extui %105 : i1 to i32
    %c0_i32_45 = arith.constant 0 : i32
    %107 = arith.cmpi ne, %106, %c0_i32_45 : i32
    scf.if %107 {
      %c0_46 = arith.constant 0 : index
      %c0_47 = arith.constant 0 : index
      %108 = vector.load %arg17[%c0_46, %c0_47] : memref<2x64xf32, #tpu.memory_space<vmem>>, vector<2x64xf32>
      %cst_48 = arith.constant 1.562500e-02 : f32
      %109 = vector.broadcast %cst_48 : f32 to vector<2x64xf32>
      %110 = arith.mulf %108, %109 : vector<2x64xf32>
      %c0_49 = arith.constant 0 : index
      %c0_50 = arith.constant 0 : index
      %111 = vector.load %arg10[%c0_49, %c0_50] : memref<64x4xf32, #tpu.memory_space<vmem>>, vector<64x4xf32>
      %cst_51 = arith.constant dense<0.000000e+00> : vector<2x4xf32>
      %112 = tpu.matmul %110, %111, %cst_51 {dimension_numbers = #tpu.dot_dimension_numbers<[1], [0], [0], [1], [0, 0, 1, 1], [], []>} : vector<2x64xf32>, vector<64x4xf32>, vector<2x4xf32> -> vector<2x4xf32>
      %c0_52 = arith.constant 0 : index
      %c0_53 = arith.constant 0 : index
      %113 = vector.load %arg11[%c0_52, %c0_53] : memref<1x4xf32, #tpu.memory_space<vmem>>, vector<1x4xf32>
      %114 = vector.broadcast %113 : vector<1x4xf32> to vector<2x4xf32>
      %115 = arith.addf %112, %114 : vector<2x4xf32>
      %cst_54 = arith.constant 0.000000e+00 : f32
      %116 = vector.broadcast %cst_54 : f32 to vector<2x4xf32>
      %117 = arith.maximumf %115, %116 : vector<2x4xf32>
      %c0_55 = arith.constant 0 : index
      %c0_56 = arith.constant 0 : index
      %118 = vector.load %arg12[%c0_55, %c0_56] : memref<4x64xf32, #tpu.memory_space<vmem>>, vector<4x64xf32>
      %cst_57 = arith.constant dense<0.000000e+00> : vector<2x64xf32>
      %119 = tpu.matmul %117, %118, %cst_57 {dimension_numbers = #tpu.dot_dimension_numbers<[1], [0], [0], [1], [0, 0, 1, 1], [], []>} : vector<2x4xf32>, vector<4x64xf32>, vector<2x64xf32> -> vector<2x64xf32>
      %c0_58 = arith.constant 0 : index
      %c0_59 = arith.constant 0 : index
      %120 = vector.load %arg13[%c0_58, %c0_59] : memref<1x64xf32, #tpu.memory_space<vmem>>, vector<1x64xf32>
      %121 = vector.broadcast %120 : vector<1x64xf32> to vector<2x64xf32>
      %122 = arith.addf %119, %121 : vector<2x64xf32>
      %123 = arith.negf %122 : vector<2x64xf32>
      %124 = math.exp %123 : vector<2x64xf32>
      %cst_60 = arith.constant 1.000000e+00 : f32
      %125 = vector.broadcast %cst_60 : f32 to vector<2x64xf32>
      %126 = arith.addf %125, %124 : vector<2x64xf32>
      %127 = arith.divf %125, %126 : vector<2x64xf32>
      %c0_61 = arith.constant 0 : index
      %c0_62 = arith.constant 0 : index
      %c0_63 = arith.constant 0 : index
      %128 = vector.load %arg16[%c0_61, %c0_62, %c0_63] : memref<2x64x64xbf16, #tpu.memory_space<vmem>>, vector<2x64x64xbf16>
      %129 = arith.extf %128 : vector<2x64x64xbf16> to vector<2x64x64xf32>
      %130 = vector.shape_cast %127 : vector<2x64xf32> to vector<2x1x64xf32>
      %131 = vector.broadcast %130 : vector<2x1x64xf32> to vector<2x64x64xf32>
      %132 = arith.addf %129, %131 : vector<2x64x64xf32>
      %cst_64 = arith.constant 0.000000e+00 : f32
      %133 = vector.broadcast %cst_64 : f32 to vector<2x64x64xf32>
      %134 = arith.maximumf %132, %133 : vector<2x64x64xf32>
      %135 = arith.truncf %134 : vector<2x64x64xf32> to vector<2x64x64xbf16>
      %c0_65 = arith.constant 0 : index
      %c0_66 = arith.constant 0 : index
      %c0_67 = arith.constant 0 : index
      %136 = vector.load %arg16[%c0_65, %c0_66, %c0_67] : memref<2x64x64xbf16, #tpu.memory_space<vmem>>, vector<2x64x64xbf16>
      tpu.vector_store %arg16[%c0_65, %c0_66, %c0_67], %135 {strides = array<i32>} : memref<2x64x64xbf16, #tpu.memory_space<vmem>>, vector<2x64x64xbf16>,
    } else {
    }
    return
  }
  func.func @transform_0(%arg0: i32, %arg1: i32) -> (i32, i32, i32) {
    %c0_i32 = arith.constant 0 : i32
    %c0_i32_0 = arith.constant 0 : i32
    return %arg0, %arg1, %c0_i32 : i32, i32, i32
  }
  func.func @transform_1(%arg0: i32, %arg1: i32) -> (i32, i32, i32) {
    %c1_i32 = arith.constant 1 : i32
    %0 = arith.addi %arg1, %c1_i32 : i32
    %c4_i32 = arith.constant 4 : i32
    %1 = arith.muli %0, %c4_i32 : i32
    %c15_i32 = arith.constant 15 : i32
    %2 = arith.minsi %1, %c15_i32 : i32
    %c0_i32 = arith.constant 0 : i32
    %c0_i32_0 = arith.constant 0 : i32
    return %arg0, %2, %c0_i32 : i32, i32, i32
  }
  func.func @transform_2(%arg0: i32, %arg1: i32) -> (i32, i32) {
    %c0_i32 = arith.constant 0 : i32
    %c0_i32_0 = arith.constant 0 : i32
    %c0_i32_1 = arith.constant 0 : i32
    return %c0_i32, %c0_i32_0 : i32, i32
  }
  func.func @transform_3(%arg0: i32, %arg1: i32) -> (i32, i32) {
    %c0_i32 = arith.constant 0 : i32
    %c0_i32_0 = arith.constant 0 : i32
    %c0_i32_1 = arith.constant 0 : i32
    return %c0_i32, %c0_i32_0 : i32, i32
  }
  func.func @transform_4(%arg0: i32, %arg1: i32) -> (i32, i32) {
    %c0_i32 = arith.constant 0 : i32
    %c0_i32_0 = arith.constant 0 : i32
    %c0_i32_1 = arith.constant 0 : i32
    return %c0_i32, %c0_i32_0 : i32, i32
  }
  func.func @transform_5(%arg0: i32, %arg1: i32) -> (i32, i32) {
    %c0_i32 = arith.constant 0 : i32
    %c0_i32_0 = arith.constant 0 : i32
    %c0_i32_1 = arith.constant 0 : i32
    return %c0_i32, %c0_i32_0 : i32, i32
  }
  func.func @transform_6(%arg0: i32, %arg1: i32) -> (i32, i32) {
    %c0_i32 = arith.constant 0 : i32
    %c0_i32_0 = arith.constant 0 : i32
    %c0_i32_1 = arith.constant 0 : i32
    return %c0_i32, %c0_i32_0 : i32, i32
  }
  func.func @transform_7(%arg0: i32, %arg1: i32) -> (i32, i32) {
    %c0_i32 = arith.constant 0 : i32
    %c0_i32_0 = arith.constant 0 : i32
    %c0_i32_1 = arith.constant 0 : i32
    return %c0_i32, %c0_i32_0 : i32, i32
  }
  func.func @transform_8(%arg0: i32, %arg1: i32) -> (i32, i32) {
    %c0_i32 = arith.constant 0 : i32
    %c0_i32_0 = arith.constant 0 : i32
    %c0_i32_1 = arith.constant 0 : i32
    return %c0_i32, %c0_i32_0 : i32, i32
  }
  func.func @transform_9(%arg0: i32, %arg1: i32) -> (i32, i32) {
    %c0_i32 = arith.constant 0 : i32
    %c0_i32_0 = arith.constant 0 : i32
    %c0_i32_1 = arith.constant 0 : i32
    return %c0_i32, %c0_i32_0 : i32, i32
  }
  func.func @transform_10(%arg0: i32, %arg1: i32) -> (i32, i32) {
    %c0_i32 = arith.constant 0 : i32
    %c0_i32_0 = arith.constant 0 : i32
    %c0_i32_1 = arith.constant 0 : i32
    return %c0_i32, %c0_i32_0 : i32, i32
  }
  func.func @transform_11(%arg0: i32, %arg1: i32) -> (i32, i32) {
    %c0_i32 = arith.constant 0 : i32
    %c0_i32_0 = arith.constant 0 : i32
    %c0_i32_1 = arith.constant 0 : i32
    return %c0_i32, %c0_i32_0 : i32, i32
  }
  func.func @transform_12(%arg0: i32, %arg1: i32) -> (i32, i32) {
    %c0_i32 = arith.constant 0 : i32
    %c0_i32_0 = arith.constant 0 : i32
    %c0_i32_1 = arith.constant 0 : i32
    return %c0_i32, %c0_i32_0 : i32, i32
  }
  func.func @transform_13(%arg0: i32, %arg1: i32) -> (i32, i32) {
    %c0_i32 = arith.constant 0 : i32
    %c0_i32_0 = arith.constant 0 : i32
    %c0_i32_1 = arith.constant 0 : i32
    return %c0_i32, %c0_i32_0 : i32, i32
  }
  func.func @transform_14(%arg0: i32, %arg1: i32) -> (i32, i32, i32) {
    %c0_i32 = arith.constant 0 : i32
    %c0_i32_0 = arith.constant 0 : i32
    %c0_i32_1 = arith.constant 0 : i32
    return %arg0, %c0_i32, %c0_i32_0 : i32, i32, i32
  }
}

</mosaic_0001>

<bundles_post_ra>
// kernel: tpu_custom_call.1
= control target key start
LH: loop header
LB: loop body
LE: loop exit
PB: predicated region body
PF: predicated region fallthrough
CT: control target
= control target key end

     0   :  { %s4416_s0 = inlined_call_operand.vmem [shape: bf16[4,128,32], index: 0, kind: input, shape index: {}]   ;;  %s4417_s1 = inlined_call_operand.vmem [shape: bf16[4,128,32], index: 1, kind: input, shape index: {}]   ;;  %s4418_s2 = inlined_call_operand.vmem [shape: bf16[32,32], index: 2, kind: input, shape index: {}]   ;;  %s4419_s3 = inlined_call_operand.vmem [shape: f32[1,32], index: 3, kind: input, shape index: {}]   ;;  %s4420_s4 = inlined_call_operand.vmem [shape: f32[3,32], index: 4, kind: input, shape index: {}]   ;;  %s4421_s5 = inlined_call_operand.vmem [shape: f32[1,32], index: 5, kind: input, shape index: {}]   ;;  %s4422_s6 = inlined_call_operand.vmem [shape: bf16[32,64], index: 6, kind: input, shape index: {}]   ;;  %s4423_s7 = inlined_call_operand.vmem [shape: f32[1,64], index: 7, kind: input, shape index: {}]   ;;  %s4424_s8 = inlined_call_operand.vmem [shape: f32[64,4], index: 8, kind: input, shape index: {}]   ;;  %s4425_s9 = inlined_call_operand.vmem [shape: f32[1,4], index: 9, kind: input, shape index: {}]   ;;  %s4426_s10 = inlined_call_operand.vmem [shape: f32[4,64], index: 10, kind: input, shape index: {}]   ;;  %s4427_s11 = inlined_call_operand.vmem [shape: f32[1,64], index: 11, kind: input, shape index: {}]   ;;  %s4428_s12 = inlined_call_operand.vmem [shape: bf16[32,64], index: 12, kind: input, shape index: {}]   ;;  %s4429_s13 = inlined_call_operand.vmem [shape: f32[1,64], index: 13, kind: input, shape index: {}]   ;;  %s4430_s14 = inlined_call_operand.hbm [shape: bf16[4,64,64], index: 14, kind: output, shape index: {}]  }
   0x1   :  { %4437 = sst [smem:[#allocation15_spill]] %s4420_s4 }
   0x2   :  { %4438 = sst [smem:[#allocation16_spill]] %s4421_s5 }
   0x3   :  { %4439 = sst [smem:[#allocation17_spill]] %s4423_s7 }
   0x4   :  { %4440 = sst [smem:[#allocation18_spill]] %s4424_s8 }
   0x5   :  { %4441 = sst [smem:[#allocation19_spill]] %s4425_s9 }
   0x6   :  { %4442 = sst [smem:[#allocation20_spill]] %s4426_s10 }
   0x7   :  { %4443 = sst [smem:[#allocation21_spill]] %s4427_s11 }
   0x8   :  { %4444 = sst [smem:[#allocation22_spill]] %s4428_s12 }
   0x9   :  { %4445 = sst [smem:[#allocation23_spill]] %s4429_s13 }
   0xa   :  { %4446 = sst [smem:[#allocation24_spill]] %s4430_s14 }
   0xb   :  { %19 = vsyncpa [#allocation7], 0 }
   0xc   :  { %21 = vsyncpa [#allocation7 + $0x1], 0  ;;  %s3416_s29 = smov 0   ;;  %s3418_s30 = smov 0  }
   0xd   :  { %s3420_s15 = smov 0   ;;  %s3422_s16 = smov 0  }
   0xe   :  { %s3424_s17 = smov 0   ;;  %s3426_s18 = smov 0  }
   0xf   :  { %s3428_s19 = smov 0   ;;  %s3430_s20 = smov 0  }
  0x10   :  { %s3432_s21 = smov 0   ;;  %s3434_s22 = smov 0  }
  0x11   :  { %s3436_s23 = smov 0   ;;  %s3438_s24 = smov 0  }
  0x12 LB: > { %4447 = sst [smem:[#allocation9_spill]] %s3317_s21  ;;  %s36_s27 = sadd.s32 1, %s3321_s22  ;;  %s3329_s24 = sphi %s3438_s24, %s27_s24   ;;  %s3325_s23 = sphi %s3436_s23, %s4501_s23   ;;  %s3321_s22 = sphi %s3434_s22, %s4500_s22   ;;  %s3317_s21 = sphi %s3432_s21, %s4499_s21   ;;  %s3313_s20 = sphi %s3430_s20, %s4498_s20   ;;  %s3309_s19 = sphi %s3428_s19, %s4497_s19   ;;  %s3305_s18 = sphi %s3426_s18, %s4496_s18   ;;  %s3301_s17 = sphi %s3424_s17, %s4495_s17   ;;  %s3297_s16 = sphi %s3422_s16, %s4494_s16   ;;  %s3293_s15 = sphi %s3420_s15, %s4493_s15   ;;  %s3289_s30 = sphi %s3418_s30, %s4492_s30   ;;  %s3285_s29 = sphi %s3416_s29, %s4491_s29  }
  0x13   : > { %s39_s28 = sadd.s32 1, %s3325_s23  ;;  %p37_p0 = scmp.ge.s32.totalorder %s36_s27, 4 }
  0x14   : > { %s48_s14 = sadd.s32 1, %s3309_s19  ;;  %p55_p1 = scmp.ne.s32.totalorder %s3309_s19, %s3305_s18 }
  0x15   : > { %p56_p2 = scmp.eq.s32.totalorder %s3329_s24, 0  ;;  %s4503_s27 = smov (%p37_p0, %s36_s27), 0 }
  0x16   : > { %4448 = sst [smem:[#allocation10_spill]] %s4503_s27  ;;  %s4505_s28 = smov (!%p37_p0, %s39_s28), %s3325_s23 }
  0x17   : > { %s44_s21 = ssub.s32 %s3321_s22, %s4503_s27  ;;  %p3491_p3 = por %p56_p2, %p55_p1 }
  0x18   : > { %p41_p4 = scmp.ge.s32.totalorder %s4505_s28, 2  ;;  %s4434_s25 = sshll.u32 %s3321_s22, 2 }
  0x19   : > { %s2912_s11 = sadd.s32 4, %s4434_s25  ;;  %s2913_s9 = sshll.u32 %s4503_s27, 2 }
  0x1a   : > { %s4507_s28 = smov (%p41_p4, %s4505_s28), 0  ;;  %p73_p5 = scmp.lt.s32.totalorder %s2912_s11, 15 }
  0x1b   : > { %4450 = sst [smem:[#allocation11_spill]] %s4507_s28  ;;  %s2914_s10 = sadd.s32 4, %s2913_s9 }
  0x1c   : > { %s43_s8 = ssub.s32 %s3325_s23, %s4507_s28  ;;  %p77_p6 = scmp.lt.s32.totalorder %s2914_s10, 15 }
  0x1d   : > { %s45_s13 = sor.u32 %s44_s21, %s43_s8  ;;  %s84_s12 = sadd.s32 1, %s3301_s17 }
  0x1e   : > { %p46_p7 = scmp.eq.s32.totalorder %s45_s13, 0  ;;  %p91_p8 = scmp.ne.s32.totalorder %s3301_s17, %s3297_s16 }
  0x1f   : > { %s4509_s11 = smov (!%p73_p5, %s2912_s11), 15  ;;  %s4511_s10 = smov (!%p77_p6, %s2914_s10), 15 }
  0x20   : > { %s3509_s25 = scalar_select %p46_p7, %s3309_s19, %s48_s14  }
  0x21   : > { %p3513_p9 = por %p91_p8, %p56_p2  ;;  %p360_p10 = scmp.eq.s32.totalorder %s43_s8, 0 }
  0x22   : > { %4451 = sst [smem:[#allocation12_spill]] %s3509_s25  ;;  %s80_s21 = ssub.s32 %s4509_s11, %s4511_s10 }
  0x23   : > { %s362_s28 = sadd.s32 1, %s3293_s15  ;;  %s81_s27 = sor.u32 %s80_s21, %s43_s8 }
  0x24   : > { %p372_p11 = scmp.ne.s32.totalorder %s3293_s15, %s3289_s30  ;;  %p82_p12 = scmp.eq.s32.totalorder %s81_s27, 0 }
  0x25   : > { %s4453_s13 = sadd.s32 4294967295, %s3329_s24   ;;  %p378_p1 = scmp.ne.s32.totalorder %s3289_s30, %s3285_s29 }
  0x26   : > { %p373_p13 = scmp.eq.s32.totalorder %s4453_s13, 7  ;;  %s4457_s25 = sadd.s32 4294967294, %s3329_s24  }
  0x27   : > { %s3524_s7 = scalar_select %p360_p10, %s3293_s15, %s362_s28  }
  0x28   : > { %s3527_s5 = scalar_select %p82_p12, %s3301_s17, %s84_s12  }
  0x29   : > { %4454 = sst [smem:[#allocation13_spill]] %s3524_s7  ;;  %p3529_p0 = por %p373_p13, %p372_p11 }
  0x2a   : > { %4455 = sst [smem:[#allocation14_spill]] %s3527_s5  ;;  %p379_p2 = scmp.eq.s32.totalorder %s4457_s25, 7 }
  0x2b   : > { %p2835_p5 = scmp.ge.s32.totalorder %s3329_s24, 8 }
  0x2c   : > { %p3537_p4 = por %p379_p2, %p378_p1 }
  0x2d   : > { %431 = sbr.rel (%p2835_p5) target bundleno = 67 (0x43), region = 64 }
  0x32   : > { %434 = sbr.rel (!%p3491_p3) target bundleno = 59 (0x3b), region = 68  ;;  %s436_s8 = sand.u32 (%p3491_p3), 1, %s3309_s19  }
  0x33   : > { %s2915_s10 = sshll.u32 (%p3491_p3), %s3325_s23, 5  ;;  %s2836_s12 = sshll.u32 (%p3491_p3), %s436_s8, 5 }
  0x34   : > { %s4459_s27 = sshll.u32 (%p3491_p3), %s3321_s22, 2  ;;  %s438_s7 = scalar_lea.vmem (%p3491_p3), [#allocation4], %s2836_s12 }
  0x35   : > { %s442_s28 = sadd.s32 (%p3491_p3), %s2915_s10, %s4459_s27 }
  0x36   : > { %s2840_s21 = sshll.u32 (%p3491_p3), %s442_s28, 2 }
  0x37   : > { %s444_s5 = scalar_lea.vmem %s4416_s0, %s2840_s21 }
  0x38   : > { %v461_v0 = vld [vmem:[%s444_s5] sm:$0xff]   ;;  %v465_v1 = vld [vmem:[%s444_s5 + $0x8] sm:$0xff]  }
  0x39   : > { %v469_v2 = vld [vmem:[%s444_s5 + $0x40] sm:$0xff]   ;;  %462 = vst [vmem:[%s438_s7] sm:$0xff] %v461_v0   ;;  %466 = vst [vmem:[%s438_s7 + $0x8] sm:$0xff] %v465_v1   ;;  %v473_v3 = vld [vmem:[%s444_s5 + $0x48] sm:$0xff]  }
  0x3a   : > { %470 = vst [vmem:[%s438_s7 + $0x10] sm:$0xff] %v469_v2   ;;  %474 = vst [vmem:[%s438_s7 + $0x18] sm:$0xff] %v473_v3  }
  0x3b PF: > { %516 = sbr.rel (!%p3513_p9) target bundleno = 67 (0x43), region = 109  ;;  %s518_s26 = sand.u32 (%p3513_p9), 1, %s3301_s17  }
  0x3c   : > { %s2918_s8 = sshll.u32 (%p3513_p9), %s3325_s23, 5  ;;  %s2841_s10 = sshll.u32 (%p3513_p9), %s518_s26, 3 }
  0x3d   : > { %s527_s27 = sadd.s32 (%p3513_p9), %s2918_s8, %s4509_s11  ;;  %s520_s5 = scalar_lea.vmem (%p3513_p9), [#allocation5], %s2841_s10 }
  0x3e   : > { %s2845_s28 = sshll.u32 (%p3513_p9), %s527_s27, 2 }
  0x3f   : > { %s529_s12 = scalar_lea.vmem (%p3513_p9), %s4417_s1, %s2845_s28 }
  0x40   : > { %v546_v4 = vld [vmem:[%s529_s12] sm:$0xf] }
  0x41   : > { %v548_v5 = vld [vmem:[%s529_s12 + $0x40] sm:$0xf]  ;;  %547 = vst [vmem:[%s520_s5] sm:$0xf] %v546_v4 }
  0x42   : > { %549 = vst [vmem:[%s520_s5 + $0x4] sm:$0xf] %v548_v5 }
  0x43 PF: > { %p2846_p3 = scmp.ge.s32.totalorder %s3329_s24, 1  ;;  %p576_p6 = scmp.lt.s32.totalorder %s3329_s24, 9 }
  0x45   : > { %p577_p7 = pnand %p2846_p3, %p576_p6 }
  0x46   : > { %s636_s7 = sand.u32 (!%p577_p7), 1, %s3289_s30   ;;  %s583_s26 = sand.u32 (!%p577_p7), 1, %s3305_s18  }
  0x47   : > { %580 = sbr.rel (%p577_p7) target bundleno = 1420 (0x58c), region = 150  ;;  %s3564_s11 = sshll.u32 (!%p577_p7), %s636_s7, 6 }
  0x48   : > { %s2847_s27 = sshll.u32 (!%p577_p7), %s583_s26, 5  ;;  %s590_s28 = sand.u32 (!%p577_p7), 1, %s3297_s16  }
  0x49   : > { %s2848_s21 = sshll.u32 (!%p577_p7), %s590_s28, 3  ;;  %s585_s25 = scalar_lea.vmem (!%p577_p7), [#allocation4], %s2847_s27 }
  0x4a   : > { %s592_s18 = scalar_lea.vmem (!%p577_p7), [#allocation5], %s2848_s21  ;;  %p811_p8 = scmp.gt.s32.totalorder (!%p577_p7), %s3313_s20, 0 }
  0x4b   : > { %p805_p9 = scmp.lt.s32.totalorder (!%p577_p7), %s3313_s20, 3  ;;  %s4460_s21 = sld [smem:[#allocation15_spill]] (!%p577_p7) }
  0x4c   : > { %v3331_v6 = vmov 0.0   ;;  %v3186_v7 = vld [vmem:[%s4418_s2 + $0x8] sm:$0xff]   ;;  %v3187_v8 = vld [vmem:[%s4418_s2] sm:$0xff]   ;;  %vm3332_vm0 = vmmov 0   ;;  %vm706_vm1 = vcmask 261120   ;;  %v3587_v12 = vld [vmem:[%s585_s25 + $0x10] sm:$0xff]   ;;  %v825_v18 = vlaneseq }
  0x4d   : > { %3006 = vmatprep.subr.bf16.mxu0 %v3331_v6  ;;  %3070 = vmatprep.subr.bf16.mxu1 %v3331_v6  ;;  %v3575_v9 = vld [vmem:[%s585_s25] sm:$0xff]   ;;  %v3581_v11 = vld [vmem:[%s585_s25 + $0x8] sm:$0xff]   ;;  %v3592_v13 = vld [vmem:[%s585_s25 + $0x18] sm:$0xff]   ;;  %v3333_v16 = vmov 1966171168   ;;  %vm848_vm5 = vcmask 261127  }
  0x4e   : > { %3007 = vmatpush3.bf16.msra.mxu0 %v3186_v7  ;;  %3010 = vmatprep.mubr.msk.bf16.mxu0 %vm3332_vm0, %v3331_v6  ;;  %v3191_v10 = vld [vmem:[%s592_s18] sm:$0xff]   ;;  %v823_v17 = vunpack.c.l.s4 %v3333_v16  ;;  %v3606_v19 = vld [vmem:[%s4419_s3] ss:$0 sm:$0xff]  ;;  %v3612_v24 = vshrl.u32 %v825_v18, 7  ;;  %s838_s8 = scalar_select %p811_p8, 1, 0 }
  0x4f   : > { %3008 = vmatprep.subr.bf16.mxu0 %v3331_v6  ;;  %3072 = vmatpush3.bf16.msra.mxu1 %v3186_v7  ;;  %v3193_v14 = vld [vmem:[%s4422_s6 + $0x8] sm:$0xff]   ;;  %v3194_v15 = vld [vmem:[%s4422_s6] sm:$0xff]   ;;  %v3334_v34 = vmov 1983009808   ;;  %s3629_s10 = scalar_select %p805_p9, 1, 0 }
  0x50   : > { %3071 = vmatprep.subr.bf16.mxu1 %v3331_v6  ;;  %3026 = vmatprep.mubr.msk.bf16.mxu1 %vm3332_vm0, %v3331_v6  ;;  %v824_v20 = vunpack.c.0.s8 %v823_v17  ;;  %v3608_v22 = vld.sshfl [vmem:[#allocation3] sm:$0x11 pattern:$0x75316420]  ;;  %v3618_v28 = vsub.s32 0, %v3612_v24  ;;  %v1037_v35 = vunpack.c.l.s4 %v3334_v34  ;;  %v839_v37 = vstv %s838_s8  ;;  %s4465_s16 = sld [smem:[#allocation16_spill]] }
  0x51   : > { %v821_v29 = vcombine.high %v3608_v22, %v3608_v22  ;;  %v951_v39 = vld [vmem:[%s4460_s21] sm:$0x7]  ;;  %v966_v40 = vsub.s32 1, %v3612_v24  ;;  %v986_v41 = vsub.s32 2, %v3612_v24  ;;  %vm869_vm2 = vcmp.lt.s32.totalorder %v3612_v24, 1  ;;  %s4476_s9 = sld [smem:[#allocation17_spill]] }
  0x52   : > { %3009 = vmatpush3.bf16.msra.mxu0 %v3187_v8  ;;  %v3623_v30 = vsub.s32 %v824_v20, %v3612_v24  ;;  %vm918_vm3 = vcmp.lt.s32.totalorder %v3612_v24, 7  ;;  %v3641_v45 = vrot.slane %v951_v39, %v3618_v28  ;;  %v1038_v50 = vunpack.c.0.s8 %v1037_v35  ;;  %s4082_s13 = scalar_lea.vmem [#allocation6], %s3564_s11  ;;  %p2870_p10 = scmp.ne.s32.totalorder %s3313_s20, 0 }
  0x53   : > { %3073 = vmatpush3.bf16.msra.mxu1 %v3187_v8  ;;  %vm3645_vm4 = vcmp.eq.s32.totalorder %v839_v37, 1  ;;  %v807_v52 = vstv %s3629_s10  ;;  %v3652_v57 = vrot.slane %v951_v39, %v966_v40  ;;  %v3654_v58 = vrot.slane %v951_v39, %v986_v41 }
  0x54   : > { %3030 = vmatprep.subr.bf16.mxu1 %v3193_v14  ;;  %v835_v46 = vrot.slane %v821_v29, %v3623_v30  ;;  %v828_v60 = vrot.slane %v3608_v22, %v3623_v30  ;;  %vm3672_vm6 = vcmp.eq.s32.totalorder %v807_v52, 1  ;;  %v3677_v5 = vadd.s32 24, %v3612_v24 }
  0x55   : > { %3011 = vmatmul.mubr.msk.bf16.vlgmr.msra.gmra.mxu0 %vm706_vm1, %v3575_v9  ;;  %v3680_v8 = vsub.s32 %v1038_v50, %v3612_v24  ;;  %vm857_vm7 = vcmp.eq.s32.totalorder %v3612_v24, 0  ;;  %vm1203_vm9 = vcmask 254976   ;;  %vm850_vm10 = vcmask 253952  }
  0x56   : > { %3014 = vmatprep.mubr.msk.bf16.mxu0 %vm3332_vm0, %v3331_v6  ;;  %3027 = vmatmul.mubr.msk.bf16.vlgmr.msra.gmra.mxu1 %vm706_vm1, %v3191_v10  ;;  %v842_v0 = vsel %vm3645_vm4, %v835_v46, 0.0  ;;  %v3687_v18 = vsel %vm3645_vm4, %v828_v60, 0.0  ;;  %vm909_vm8 = vcmp.eq.s32.totalorder %v3677_v5, 31  ;;  %vm1535_vm11 = vcmask 1041409  }
  0x57   : > { %3031 = vmatpush3.bf16.msra.mxu1 %v3193_v14  ;;  %v895_v16 = vrot.slane %v842_v0, %v3618_v28  ;;  %v891_v39 = vrot.slane %v3687_v18, %v3618_v28  ;;  %vm1537_vm12 = vcmask 1042434   ;;  %vm1539_vm13 = vcmask 1043459  }
  0x58   : > { %3032 = vmatprep.subr.bf16.mxu1 %v3194_v15  ;;  %vm1541_vm14 = vcmask 1044484   ;;  %vm1543_vm15 = vcmask 1045509  }
  0x5b   : > { %3033 = vmatpush3.bf16.msra.mxu1 %v3194_v15 }
  0x5d   : > { %3015 = vmatmul.mubr.msk.bf16.gmra.mxu0 %vm706_vm1, %v3581_v11 }
  0x5e   : > { %3018 = vmatprep.mubr.msk.bf16.mxu0 %vm3332_vm0, %v3331_v6 }
  0x65   : > { %3019 = vmatmul.mubr.msk.bf16.gmra.mxu0 %vm706_vm1, %v3587_v12 }
  0x66   : > { %3022 = vmatprep.mubr.msk.bf16.mxu0 %vm3332_vm0, %v3331_v6  ;;  %vm1545_vm0 = vcmask 1046534  }
  0x6d   : > { %3023 = vmatmul.mubr.msk.bf16.gmra.mxu0 %vm706_vm1, %v3592_v13 }
 0x115   : > { %v756_v21 = vpop.f32.mrf.mxu0 }
 0x116   : > { %v757_v23 = vadd.f32 %v3606_v19, %v756_v21  ;;  %v788_v25 = vpop.f32.mrf.mxu1 }
 0x117   : > { %v3012_v26 = vpop.f32.mrf.mxu0  ;;  %v3615_v27 = vadd.f32 %v3606_v19, %v788_v25 }
 0x118   : > { %v3028_v31 = vpop.f32.mrf.mxu1  ;;  %v3625_v32 = vmax.f32 %v757_v23, 0.0 }
 0x119   : > { %v759_v33 = vpop.f32.mrf.mxu0  ;;  %v803_v17 = vmax.f32 %v3615_v27, 0.0  ;;  %v3700_v27 = vld [vmem:[%s4465_s16] ss:$0 sm:$0xff] }
 0x11a   : > { %v760_v36 = vadd.f32 %v3606_v19, %v759_v33  ;;  %v791_v38 = vpop.f32.mrf.mxu1  ;;  %v861_v48 = vrot.slane %v3625_v32, 7  ;;  %v910_v53 = vrot.slane %v3625_v32, 1 }
 0x11b   : > { %v3013_v42 = vpop.f32.mrf.mxu0  ;;  %v792_v43 = vadd.f32 %v3606_v19, %v791_v38  ;;  %v809_v37 = vsel %vm3672_vm6, %v803_v17, 0.0 }
 0x11c   : > { %v796_v44 = vmax.f32 %v760_v36, 0.0  ;;  %v3029_v47 = vpop.f32.mrf.mxu1 }
 0x11d   : > { %v764_v49 = vpop.f32.mrf.mxu0  ;;  %v804_v23 = vmax.f32 %v792_v43, 0.0 }
 0x11e   : > { %v862_v54 = vrot.slane %v796_v44, 7  ;;  %v911_v55 = vrot.slane %v796_v44, 1  ;;  %v765_v56 = vadd.f32 %v3606_v19, %v764_v49  ;;  %v969_v2 = vmul.f32 %v3652_v57, %v796_v44 }
 0x11f   : > { %v3016_v59 = vpop.f32.mrf.mxu0  ;;  %v3715_v43 = vsel %vm3672_vm6, %v804_v23, 0.0  ;;  %v3719_v44 = vmul.f32 %v3652_v57, %v3625_v32 }
 0x120   : > { %v876_v61 = vsel %vm869_vm2, %v861_v48, %v862_v54  ;;  %v3666_v62 = vsel %vm918_vm3, %v910_v53, %v911_v55  ;;  %v797_v63 = vmax.f32 %v765_v56, 0.0 }
 0x121   : > { %v957_v1 = vmul.f32 %v3641_v45, %v876_v61  ;;  %v767_v3 = vpop.f32.mrf.mxu0 }
 0x122   : > { %v863_v6 = vrot.slane %v797_v63, 7  ;;  %v912_v7 = vrot.slane %v797_v63, 1  ;;  %v768_v10 = vadd.f32 %v3606_v19, %v767_v3  ;;  %v970_v35 = vmul.f32 %v3652_v57, %v797_v63 }
 0x123   : > { %v977_v14 = vadd.f32 %v969_v2, %v957_v1  ;;  %v3017_v15 = vpop.f32.mrf.mxu0  ;;  %v942_v63 = vrot.slane %v3715_v43, %v3618_v28 }
 0x124   : > { %v875_v20 = vsel %vm869_vm2, %v862_v54, %v863_v6  ;;  %v924_v21 = vsel %vm918_vm3, %v911_v55, %v912_v7  ;;  %v798_v22 = vmax.f32 %v768_v10, 0.0  ;;  %v938_v54 = vrot.slane %v809_v37, %v3618_v28 }
 0x125   : > { %v958_v25 = vmul.f32 %v3641_v45, %v875_v20  ;;  %v989_v26 = vmul.f32 %v3654_v58, %v924_v21  ;;  %v772_v29 = vpop.f32.mrf.mxu0 }
 0x126   : > { %849 = vst.msk [vmem:[#allocation3 - $0x7] sm:$0x80] %vm848_vm5, %v798_v22  ;;  %v864_v31 = vrot.slane %v798_v22, 7  ;;  %v913_v33 = vrot.slane %v798_v22, 1  ;;  %v773_v34 = vadd.f32 %v3606_v19, %v772_v29  ;;  %v971_v0 = vmul.f32 %v3652_v57, %v798_v22 }
 0x127   : > { %v997_v36 = vadd.f32 %v989_v26, %v977_v14  ;;  %v3020_v38 = vpop.f32.mrf.mxu0  ;;  %v978_v46 = vadd.f32 %v970_v35, %v958_v25  ;;  %v3753_v35 = vmul.f32 %v3654_v58, %v3666_v62 }
 0x128   : > { %v874_v40 = vsel %vm869_vm2, %v863_v6, %v864_v31  ;;  %v923_v41 = vsel %vm918_vm3, %v912_v7, %v913_v33  ;;  %v799_v42 = vmax.f32 %v773_v34, 0.0 }
 0x129   : > { %v1012_v47 = vadd.f32 %v3700_v27, %v997_v36  ;;  %v990_v49 = vmul.f32 %v3654_v58, %v923_v41  ;;  %v775_v50 = vpop.f32.mrf.mxu0  ;;  %v959_v59 = vmul.f32 %v3641_v45, %v874_v40 }
 0x12a   : > { %v865_v51 = vrot.slane %v799_v42, 7  ;;  %v914_v52 = vrot.slane %v799_v42, 1  ;;  %v776_v55 = vadd.f32 %v3606_v19, %v775_v50  ;;  %v972_v10 = vmul.f32 %v3652_v57, %v799_v42 }
 0x12b   : > { %v1020_v56 = vmax.f32 %v1012_v47, 0.0  ;;  %v998_v60 = vadd.f32 %v990_v49, %v978_v46  ;;  %v3021_v61 = vpop.f32.mrf.mxu0  ;;  %v979_v25 = vadd.f32 %v971_v0, %v959_v59 }
 0x12c   : > { %v873_v1 = vsel %vm869_vm2, %v864_v31, %v865_v51  ;;  %v922_v2 = vsel %vm918_vm3, %v913_v33, %v914_v52  ;;  %v3733_v3 = vmax.f32 %v776_v55, 0.0 }
 0x12d   : > { %v1059_v4 = vrot.slane %v1020_v56, %v3680_v8  ;;  %v1013_v6 = vadd.f32 %v3700_v27, %v998_v60  ;;  %v902_v7 = vsel %vm857_vm7, %v895_v16, %v873_v1  ;;  %v780_v14 = vpop.f32.mrf.mxu0  ;;  %v946_v17 = vsel %vm909_vm8, %v938_v54, %v922_v2 }
 0x12e   : > { %v960_v15 = vmul.f32 %v3641_v45, %v902_v7  ;;  %v866_v20 = vrot.slane %v3733_v3, 7  ;;  %v915_v21 = vrot.slane %v3733_v3, 1  ;;  %v1052_v22 = vcombine.high %v1020_v56, %v1020_v56 }
 0x12f   : > { %v1232_v23 = vsel %vm1203_vm9, %v1059_v4, -inf  ;;  %v1021_v26 = vmax.f32 %v1013_v6, 0.0  ;;  %v3024_v29 = vpop.f32.mrf.mxu0  ;;  %v991_v33 = vmul.f32 %v3654_v58, %v946_v17  ;;  %v1067_v41 = vcombine.high %v1059_v4, %v1059_v4 }
 0x130   : > { %v1233_v31 = vrot.slane %v1232_v23, 4  ;;  %v980_v16 = vadd.f32 %v972_v10, %v960_v15  ;;  %v872_v34 = vsel %vm869_vm2, %v865_v51, %v866_v20  ;;  %v921_v38 = vsel %vm918_vm3, %v914_v52, %v915_v21 }
 0x131   : > { %v1069_v36 = vcombine.high %v1021_v26, %v1021_v26  ;;  %v1076_v37 = vrot.slane %v1021_v26, %v3680_v8  ;;  %v783_v40 = vpop.f32.mrf.mxu0  ;;  %v999_v46 = vadd.f32 %v991_v33, %v979_v25  ;;  %v961_v47 = vmul.f32 %v3641_v45, %v872_v34 }
 0x132   : > { %v1234_v42 = vmax.f32 %v1232_v23, %v1233_v31  ;;  %v973_v51 = vmul.f32 %v3652_v57, %v3733_v3  ;;  %v3766_v55 = vrot.slane %v1052_v22, %v3680_v8  ;;  %v992_v59 = vmul.f32 %v3654_v58, %v921_v38 }
 0x133   : > { %v1083_v49 = vrot.slane %v1069_v36, %v3680_v8  ;;  %v1084_v50 = vcombine.high %v1076_v37, %v1076_v37  ;;  %v1260_v62 = vsel %vm1203_vm9, %v1076_v37, -inf  ;;  %v3025_v54 = vpop.f32.mrf.mxu0  ;;  %v1014_v52 = vadd.f32 %v3700_v27, %v999_v46 }
 0x134   : > { %v1261_v56 = vrot.slane %v1260_v62, 4  ;;  %v3772_v1 = vadd.f32 %v973_v51, %v961_v47  ;;  %v1235_v2 = vrot.slane %v1234_v42, 2  ;;  %v3775_v10 = vsel %vm1203_vm9, %v1067_v41, -inf }
 0x135   : > { %v1085_v60 = vcombine.high %v1083_v49, %v1083_v49  ;;  %v1267_v61 = vsel %vm1203_vm9, %v1084_v50, -inf  ;;  %v1274_v0 = vsel %vm1203_vm9, %v1083_v49, -inf  ;;  %v1022_v15 = vmax.f32 %v1014_v52, 0.0 }
 0x136   : > { %v1262_v4 = vmax.f32 %v1260_v62, %v1261_v56  ;;  %v1268_v6 = vrot.slane %v1267_v61, 4  ;;  %v1275_v7 = vrot.slane %v1274_v0, 4  ;;  %v1000_v17 = vadd.f32 %v992_v59, %v980_v16 }
 0x137   : > { %v781_v22 = vadd.f32 %v3606_v19, %v780_v14  ;;  %v3781_v29 = vsel %vm1203_vm9, %v1085_v60, -inf  ;;  %v1086_v31 = vcombine.high %v1022_v15, %v1022_v15  ;;  %v1093_v33 = vrot.slane %v1022_v15, %v3680_v8 }
 0x138   : > { %v1263_v23 = vrot.slane %v1262_v4, 2  ;;  %v1269_v25 = vmax.f32 %v1267_v61, %v1268_v6  ;;  %v3778_v26 = vmax.f32 %v1274_v0, %v1275_v7  ;;  %v1015_v34 = vadd.f32 %v3700_v27, %v1000_v17 }
 0x139   : > { %v3785_v36 = vmax.f32 %v781_v22, 0.0  ;;  %v3787_v37 = vmax.f32 %v1234_v42, %v1235_v2  ;;  %v3793_v41 = vrot.slane %v1086_v31, %v3680_v8  ;;  %v1101_v46 = vcombine.high %v1093_v33, %v1093_v33 }
 0x13a   : > { %v3790_v38 = vmax.f32 %v1262_v4, %v1263_v23  ;;  %v1270_v14 = vrot.slane %v1269_v25, 2  ;;  %v1288_v47 = vsel %vm1203_vm9, %v1093_v33, -inf  ;;  %v1023_v49 = vmax.f32 %v1015_v34, 0.0 }
 0x13b   : > { %v1289_v51 = vrot.slane %v1288_v47, 4  ;;  %v867_v42 = vrot.slane %v3785_v36, 7  ;;  %v1295_v54 = vsel %vm1203_vm9, %v1101_v46, -inf  ;;  %v3802_v56 = vsel %vm1203_vm9, %v3793_v41, -inf }
 0x13c   : > { %v1103_v52 = vcombine.high %v1023_v49, %v1023_v49  ;;  %v784_v59 = vadd.f32 %v3606_v19, %v783_v40  ;;  %v3806_v61 = vmax.f32 %v1269_v25, %v1270_v14  ;;  %v1110_v2 = vrot.slane %v1023_v49, %v3680_v8 }
 0x13d   : > { %v1290_v4 = vmax.f32 %v1288_v47, %v1289_v51  ;;  %v871_v7 = vsel %vm869_vm2, %v866_v20, %v867_v42  ;;  %v916_v19 = vrot.slane %v3785_v36, 1  ;;  %v1296_v40 = vrot.slane %v1295_v54, 4 }
 0x13e   : > { %v1117_v6 = vrot.slane %v1103_v52, %v3680_v8  ;;  %v1118_v17 = vcombine.high %v1110_v2, %v1110_v2  ;;  %v1316_v22 = vsel %vm1203_vm9, %v1110_v2, -inf  ;;  %v962_v14 = vmul.f32 %v3641_v45, %v871_v7 }
 0x13f   : > { %v1317_v25 = vrot.slane %v1316_v22, 4  ;;  %v920_v33 = vsel %vm918_vm3, %v915_v21, %v916_v19  ;;  %v974_v46 = vmul.f32 %v3652_v57, %v3785_v36  ;;  %v802_v0 = vmax.f32 %v784_v59, 0.0 }
 0x140   : > { %v1119_v23 = vcombine.high %v1117_v6, %v1117_v6  ;;  %v1330_v31 = vsel %vm1203_vm9, %v1117_v6, -inf  ;;  %v1323_v34 = vsel %vm1203_vm9, %v1118_v17, -inf  ;;  %v993_v52 = vmul.f32 %v3654_v58, %v920_v33 }
 0x141   : > { %v1331_v20 = vrot.slane %v1330_v31, 4  ;;  %v1318_v47 = vmax.f32 %v1316_v22, %v1317_v25  ;;  %v1324_v49 = vrot.slane %v1323_v34, 4  ;;  %v982_v3 = vadd.f32 %v974_v46, %v962_v14 }
 0x142   : > { %v1337_v51 = vsel %vm1203_vm9, %v1119_v23, -inf  ;;  %v1291_v15 = vrot.slane %v1290_v4, 2  ;;  %v1001_v17 = vadd.f32 %v993_v52, %v3772_v1  ;;  %v3831_v60 = vmax.f32 %v1295_v54, %v1296_v40 }
 0x143   : > { %v1332_v2 = vmax.f32 %v1330_v31, %v1331_v20  ;;  %v1338_v6 = vrot.slane %v1337_v51, 4  ;;  %v1319_v21 = vrot.slane %v1318_v47, 2  ;;  %v1325_v62 = vmax.f32 %v1323_v34, %v1324_v49 }
 0x144   : > { %v845_v36 = vrot.slane %v802_v0, 7  ;;  %v1016_v23 = vadd.f32 %v3700_v27, %v1001_v17  ;;  %v917_v16 = vrot.slane %v802_v0, 1  ;;  %v3846_v14 = vmax.f32 %v1290_v4, %v1291_v15 }
 0x145   : > { %v1333_v7 = vrot.slane %v1332_v2, 2  ;;  %v1339_v50 = vmax.f32 %v1337_v51, %v1338_v6  ;;  %v1320_v22 = vmax.f32 %v1318_v47, %v1319_v21  ;;  %v1326_v25 = vrot.slane %v1325_v62, 2 }
 0x146   : > { %851 = vst.msk [vmem:[#allocation3 + $0x1] sm:$0x1] %vm850_vm10, %v845_v36  ;;  %v870_v59 = vsel %vm869_vm2, %v867_v42, %v845_v36  ;;  %v877_v1 = vsel %vm869_vm2, %v845_v36, %v861_v48  ;;  %v1024_v34 = vmax.f32 %v1016_v23, 0.0  ;;  %v975_v42 = vmul.f32 %v3652_v57, %v802_v0 }
 0x147   : > { %v1334_v33 = vmax.f32 %v1332_v2, %v1333_v7  ;;  %v1340_v31 = vrot.slane %v1339_v50, 2  ;;  %v1321_v54 = vrot.slane %v1320_v22, 1  ;;  %v1327_v40 = vmax.f32 %v1325_v62, %v1326_v25 }
 0x148   : > { %v898_v20 = vsel %vm857_vm7, %v891_v39, %v877_v1  ;;  %v1120_v52 = vcombine.high %v1024_v34, %v1024_v34  ;;  %v1127_v48 = vrot.slane %v1024_v34, %v3680_v8  ;;  %v919_v2 = vsel %vm918_vm3, %v916_v19, %v917_v16 }
 0x149   : > { %v1335_v46 = vrot.slane %v1334_v33, 1  ;;  %v3848_v47 = vmax.f32 %v1339_v50, %v1340_v31  ;;  %v1322_v49 = vmax.f32 %v1320_v22, %v1321_v54  ;;  %v1328_v51 = vrot.slane %v1327_v40, 1 }
 0x14a   : > { %v956_v18 = vmul.f32 %v3641_v45, %v898_v20  ;;  %v963_v39 = vmul.f32 %v3641_v45, %v870_v59  ;;  %v3857_v50 = vrot.slane %v1120_v52, %v3680_v8  ;;  %v1135_v6 = vcombine.high %v1127_v48, %v1127_v48 }
 0x14b   : > { %v1336_v62 = vmax.f32 %v1334_v33, %v1335_v46  ;;  %v1329_v4 = vmax.f32 %v1327_v40, %v1328_v51  ;;  %v1444_v15 = vpack.c.bf16 %v1322_v49, %v1322_v49  ;;  %v1344_v57 = vsel %vm1203_vm9, %v1127_v48, -inf }
 0x14c   : > { %v926_v0 = vsel %vm918_vm3, %v917_v16, %v910_v53  ;;  %v976_v21 = vadd.f32 %v3719_v44, %v956_v18  ;;  %v1345_v7 = vrot.slane %v1344_v57, 4  ;;  %v983_v36 = vadd.f32 %v975_v42, %v963_v39 }
 0x14d   : > { %v1446_v17 = vpack.c.bf16 %v1336_v62, %v1336_v62  ;;  %v1445_v22 = vpack.c.bf16 %v1329_v4, %v1329_v4  ;;  %v1351_v25 = vsel %vm1203_vm9, %v1135_v6, -inf  ;;  %v1358_v23 = vsel %vm1203_vm9, %v3857_v50, -inf }
 0x14e   : > { %v994_v32 = vmul.f32 %v3654_v58, %v919_v2  ;;  %v3872_v24 = vunpack.c.l.b16 %v1444_v15  ;;  %v1346_v53 = vmax.f32 %v1344_v57, %v1345_v7  ;;  %v1352_v44 = vrot.slane %v1351_v25, 4 }
 0x14f   : > { %v1359_v16 = vrot.slane %v1358_v23, 4  ;;  %v996_v33 = vadd.f32 %v3753_v35, %v976_v21  ;;  %v950_v59 = vsel %vm909_vm8, %v942_v63, %v926_v0  ;;  %v1237_v1 = vrot.slane %v3787_v37, 1 }
 0x150   : > { %v1002_v31 = vadd.f32 %v994_v32, %v982_v3  ;;  %v1347_v54 = vrot.slane %v1346_v53, 2  ;;  %v1353_v40 = vmax.f32 %v1351_v25, %v1352_v44  ;;  %v995_v20 = vmul.f32 %v3654_v58, %v950_v59 }
 0x151   : > { %v3881_v34 = vmax.f32 %v1358_v23, %v1359_v16  ;;  %v1011_v35 = vadd.f32 %v3700_v27, %v996_v33  ;;  %v4466_v43 = vrot.slane %v3775_v10, 4  ;;  %v3891_v63 = vunpack.c.l.b16 %v1446_v17 }
 0x152   : > { %v1017_v3 = vadd.f32 %v3700_v27, %v1002_v31  ;;  %v3893_v42 = vmax.f32 %v1346_v53, %v1347_v54  ;;  %v1354_v49 = vrot.slane %v1353_v40, 2  ;;  %v1003_v51 = vadd.f32 %v995_v20, %v983_v36 }
 0x153   : > { %v1241_v5 = vmax.f32 %v3775_v10, %v4466_v43  ;;  %v3895_v52 = vunpack.c.l.b16 %v1445_v22  ;;  %v1019_v58 = vmax.f32 %v1011_v35, 0.0  ;;  %v3899_v62 = vsel %vm1203_vm9, %v3766_v55, -inf }
 0x154   : > { %v1025_v48 = vmax.f32 %v1017_v3, 0.0  ;;  %v1018_v18 = vadd.f32 %v3700_v27, %v1003_v51  ;;  %v3904_v10 = vmax.f32 %v3787_v37, %v1237_v1  ;;  %v1349_v0 = vrot.slane %v3893_v42, 1 }
 0x155   : > { %v1242_v39 = vrot.slane %v1241_v5, 2  ;;  %v1035_v4 = vcombine.high %v1019_v58, %v1019_v58  ;;  %v1042_v15 = vrot.slane %v1019_v58, %v3680_v8  ;;  %v3909_v21 = vmax.f32 %v1353_v40, %v1354_v49 }
 0x156   : > { %v1137_v6 = vcombine.high %v1025_v48, %v1025_v48  ;;  %v1144_v57 = vrot.slane %v1025_v48, %v3680_v8  ;;  %v1026_v17 = vmax.f32 %v1018_v18, 0.0  ;;  %v1247_v7 = vrot.slane %v3899_v62, 4 }
 0x157   : > { %v1049_v36 = vrot.slane %v1035_v4, %v3680_v8  ;;  %v1050_v27 = vcombine.high %v1042_v15, %v1042_v15  ;;  %v1204_v25 = vsel %vm1203_vm9, %v1042_v15, -inf  ;;  %v3916_v53 = vmax.f32 %v1241_v5, %v1242_v39 }
 0x158   : > { %v1151_v37 = vrot.slane %v1137_v6, %v3680_v8  ;;  %v1152_v22 = vcombine.high %v1144_v57, %v1144_v57  ;;  %v1372_v23 = vsel %vm1203_vm9, %v1144_v57, -inf  ;;  %v1154_v32 = vcombine.high %v1026_v17, %v1026_v17 }
 0x159   : > { %v1051_v44 = vcombine.high %v1049_v36, %v1049_v36  ;;  %v1205_v33 = vrot.slane %v1204_v25, 4  ;;  %v1211_v31 = vsel %vm1203_vm9, %v1050_v27, -inf  ;;  %v1218_v1 = vsel %vm1203_vm9, %v1049_v36, -inf }
 0x15a   : > { %v1153_v16 = vcombine.high %v1151_v37, %v1151_v37  ;;  %v1212_v59 = vrot.slane %v1211_v31, 4  ;;  %v1373_v54 = vrot.slane %v1372_v23, 4  ;;  %v1379_v40 = vsel %vm1203_vm9, %v1152_v22, -inf }
 0x15b   : > { %v1206_v20 = vmax.f32 %v1204_v25, %v1205_v33  ;;  %v1219_v35 = vrot.slane %v1218_v1, 4  ;;  %v1225_v3 = vsel %vm1203_vm9, %v1051_v44, -inf  ;;  %v1380_v43 = vrot.slane %v1379_v40, 4 }
 0x15c   : > { %v1213_v49 = vmax.f32 %v1211_v31, %v1212_v59  ;;  %v1374_v51 = vmax.f32 %v1372_v23, %v1373_v54  ;;  %v1386_v5 = vsel %vm1203_vm9, %v1151_v37, -inf  ;;  %v1161_v58 = vrot.slane %v1026_v17, %v3680_v8 }
 0x15d   : > { %v1207_v48 = vrot.slane %v1206_v20, 2  ;;  %v1220_v18 = vmax.f32 %v1218_v1, %v1219_v35  ;;  %v1381_v39 = vmax.f32 %v1379_v40, %v1380_v43  ;;  %v1387_v4 = vrot.slane %v1386_v5, 4 }
 0x15e   : > { %v1226_v15 = vrot.slane %v1225_v3, 4  ;;  %v1375_v6 = vrot.slane %v1374_v51, 2  ;;  %v1393_v57 = vsel %vm1203_vm9, %v1153_v16, -inf  ;;  %v1168_v36 = vrot.slane %v1154_v32, %v3680_v8 }
 0x15f   : > { %v1208_v27 = vmax.f32 %v1206_v20, %v1207_v48  ;;  %v1214_v22 = vrot.slane %v1213_v49, 2  ;;  %v1382_v25 = vrot.slane %v1381_v39, 2  ;;  %v1388_v44 = vmax.f32 %v1386_v5, %v1387_v4 }
 0x160   : > { %v1221_v33 = vrot.slane %v1220_v18, 2  ;;  %v1376_v23 = vmax.f32 %v1374_v51, %v1375_v6  ;;  %v1394_v31 = vrot.slane %v1393_v57, 4  ;;  %v1169_v37 = vcombine.high %v1161_v58, %v1161_v58 }
 0x161   : > { %v1209_v59 = vrot.slane %v1208_v27, 1  ;;  %v1383_v17 = vmax.f32 %v1381_v39, %v1382_v25  ;;  %v1389_v54 = vrot.slane %v1388_v44, 2  ;;  %v1170_v1 = vcombine.high %v1168_v36, %v1168_v36 }
 0x162   : > { %v1377_v40 = vrot.slane %v1376_v23, 1  ;;  %v1395_v35 = vmax.f32 %v1393_v57, %v1394_v31  ;;  %v1400_v43 = vsel %vm1203_vm9, %v1161_v58, -inf  ;;  %v1407_v16 = vsel %vm1203_vm9, %v1169_v37, -inf }
 0x163   : > { %v1384_v46 = vrot.slane %v1383_v17, 1  ;;  %v1390_v32 = vmax.f32 %v1388_v44, %v1389_v54  ;;  %v1401_v20 = vrot.slane %v1400_v43, 4  ;;  %v1408_v48 = vrot.slane %v1407_v16, 4 }
 0x164   : > { %v1378_v2 = vmax.f32 %v1376_v23, %v1377_v40  ;;  %v1396_v5 = vrot.slane %v1395_v35, 2  ;;  %v1414_v51 = vsel %vm1203_vm9, %v1168_v36, -inf  ;;  %v3930_v4 = vsel %vm1203_vm9, %v1170_v1, -inf }
 0x165   : > { %v1385_v39 = vmax.f32 %v1383_v17, %v1384_v46  ;;  %v1391_v6 = vrot.slane %v1390_v32, 1  ;;  %v1402_v25 = vmax.f32 %v1400_v43, %v1401_v20  ;;  %v1409_v45 = vmax.f32 %v1407_v16, %v1408_v48 }
 0x166   : > { %v1215_v57 = vmax.f32 %v1213_v49, %v1214_v22  ;;  %v3932_v31 = vmax.f32 %v1395_v35, %v1396_v5  ;;  %v1452_v58 = vpack.c.bf16 %v1378_v2, %v1378_v2  ;;  %v1415_v37 = vrot.slane %v1414_v51, 4 }
 0x167   : > { %v3934_v19 = vmax.f32 %v1390_v32, %v1391_v6  ;;  %v1453_v44 = vpack.c.bf16 %v1385_v39, %v1385_v39  ;;  %v1403_v54 = vrot.slane %v1402_v25, 2  ;;  %v1248_v36 = vmax.f32 %v3899_v62, %v1247_v7 }
 0x168   : > { %v3942_v46 = vmax.f32 %v3893_v42, %v1349_v0  ;;  %v1398_v23 = vrot.slane %v3932_v31, 1  ;;  %v1410_v49 = vrot.slane %v1409_v45, 2  ;;  %v1422_v22 = vrot.slane %v3930_v4, 4 }
 0x169   : > { %v3946_v2 = vunpack.c.l.b16 %v1452_v58  ;;  %v1404_v17 = vmax.f32 %v1402_v25, %v1403_v54  ;;  %v3948_v1 = vmax.f32 %v1414_v51, %v1415_v37  ;;  %v3950_v40 = vmax.f32 %v1208_v27, %v1209_v59 }
 0x16a   : > { %v1454_v62 = vpack.c.bf16 %v3934_v19, %v3934_v19  ;;  %v1216_v7 = vrot.slane %v1215_v57, 1  ;;  %v1222_v35 = vmax.f32 %v1220_v18, %v1221_v33  ;;  %v1227_v43 = vmax.f32 %v1225_v3, %v1226_v15 }
 0x16b   : > { %v3954_v42 = vunpack.c.l.b16 %v1453_v44  ;;  %v1405_v0 = vrot.slane %v1404_v17, 1  ;;  %v1244_v16 = vrot.slane %v3916_v53, 1  ;;  %v1249_v32 = vrot.slane %v1248_v36, 2 }
 0x16c   : > { %v3957_v20 = vmax.f32 %v1409_v45, %v1410_v49  ;;  %v1223_v48 = vrot.slane %v1222_v35, 1  ;;  %v1228_v5 = vrot.slane %v1227_v43, 2  ;;  %v4467_v27 = vcombine.high %v3766_v55, %v3766_v55 }
 0x16d   : > { %v1417_v51 = vrot.slane %v3948_v1, 2  ;;  %v3964_v39 = vmax.f32 %v1215_v57, %v1216_v7  ;;  %v1250_v3 = vmax.f32 %v1248_v36, %v1249_v32  ;;  %v3966_v15 = vmax.f32 %v1404_v17, %v1405_v0 }
 0x16e   : > { %v1253_v59 = vsel %vm1203_vm9, %v4467_v27, -inf  ;;  %v1229_v33 = vmax.f32 %v1227_v43, %v1228_v5  ;;  %v3969_v6 = vmax.f32 %v3916_v53, %v1244_v16  ;;  %v1272_v45 = vrot.slane %v3806_v61, 1 }
 0x16f   : > { %v1254_v18 = vrot.slane %v1253_v59, 4  ;;  %v1224_v25 = vmax.f32 %v1222_v35, %v1223_v48  ;;  %v1251_v58 = vrot.slane %v1250_v3, 1  ;;  %v4468_v55 = vrot.slane %v3778_v26, 2 }
 0x170   : > { %v1230_v54 = vrot.slane %v1229_v33, 1  ;;  %v4469_v57 = vrot.slane %v3790_v38, 1  ;;  %v4470_v49 = vrot.slane %v3781_v29, 4  ;;  %v1293_v17 = vrot.slane %v3846_v14, 1 }
 0x171   : > { %v1255_v37 = vmax.f32 %v1253_v59, %v1254_v18  ;;  %v1278_v44 = vmax.f32 %v3778_v26, %v4468_v55  ;;  %v1252_v7 = vmax.f32 %v1250_v3, %v1251_v58  ;;  %v1273_v43 = vmax.f32 %v3806_v61, %v1272_v45 }
 0x172   : > { %v3978_v36 = vmax.f32 %v3790_v38, %v4469_v57  ;;  %v1283_v53 = vmax.f32 %v3781_v29, %v4470_v49  ;;  %v1231_v16 = vmax.f32 %v1229_v33, %v1230_v54  ;;  %v1294_v26 = vmax.f32 %v3846_v14, %v1293_v17 }
 0x173   : > { %v1256_v35 = vrot.slane %v1255_v37, 2  ;;  %v1279_v0 = vrot.slane %v1278_v44, 1  ;;  %v1298_v48 = vrot.slane %v3831_v60, 2  ;;  %v4471_v27 = vrot.slane %v3802_v56, 4 }
 0x174   : > { %v1284_v32 = vrot.slane %v1283_v53, 2  ;;  %v4472_v29 = vcombine.high %v3793_v41, %v3793_v41  ;;  %v1428_v14 = vpack.c.bf16 %v3950_v40, %v3950_v40  ;;  %v1430_v55 = vpack.c.bf16 %v1224_v25, %v1224_v25 }
 0x175   : > { %v1257_v5 = vmax.f32 %v1255_v37, %v1256_v35  ;;  %v1280_v38 = vmax.f32 %v1278_v44, %v1279_v0  ;;  %v1304_v59 = vmax.f32 %v3802_v56, %v4471_v27  ;;  %v1299_v61 = vmax.f32 %v3831_v60, %v1298_v48 }
 0x176   : > { %v1309_v3 = vsel %vm1203_vm9, %v4472_v29, -inf  ;;  %v1285_v18 = vmax.f32 %v1283_v53, %v1284_v32  ;;  %v1429_v37 = vpack.c.bf16 %v3964_v39, %v3964_v39  ;;  %v1431_v41 = vpack.c.bf16 %v1231_v16, %v1231_v16 }
 0x177   : > { %v1310_v33 = vrot.slane %v1309_v3, 4  ;;  %v1258_v45 = vrot.slane %v1257_v5, 1  ;;  %v1305_v58 = vrot.slane %v1304_v59, 2  ;;  %v1300_v44 = vrot.slane %v1299_v61, 1 }
 0x178   : > { %v1286_v56 = vrot.slane %v1285_v18, 1  ;;  %v1432_v60 = vpack.c.bf16 %v3904_v10, %v3904_v10  ;;  %v1433_v40 = vpack.c.bf16 %v3969_v6, %v3969_v6  ;;  %v1434_v39 = vpack.c.bf16 %v1252_v7, %v1252_v7 }
 0x179   : > { %v1311_v54 = vmax.f32 %v1309_v3, %v1310_v33  ;;  %v1259_v57 = vmax.f32 %v1257_v5, %v1258_v45  ;;  %v1306_v49 = vmax.f32 %v1304_v59, %v1305_v58  ;;  %v1301_v17 = vmax.f32 %v1299_v61, %v1300_v44 }
 0x17a   : > { %v1287_v53 = vmax.f32 %v1285_v18, %v1286_v56  ;;  %v1436_v16 = vpack.c.bf16 %v3978_v36, %v3978_v36  ;;  %v1437_v32 = vpack.c.bf16 %v1273_v43, %v1273_v43  ;;  %v1438_v5 = vpack.c.bf16 %v1280_v38, %v1280_v38 }
 0x17b   : > { %v1312_v35 = vrot.slane %v1311_v54, 2  ;;  %v1307_v25 = vrot.slane %v1306_v49, 1  ;;  %v1435_v0 = vpack.c.bf16 %v1259_v57, %v1259_v57  ;;  %v1440_v10 = vpack.c.bf16 %v1294_v26, %v1294_v26 }
 0x17c   : > { %v1439_v27 = vpack.c.bf16 %v1287_v53, %v1287_v53  ;;  %v1441_v6 = vpack.c.bf16 %v1301_v17, %v1301_v17  ;;  %v1503_v29 = vunpack.c.l.b16 %v1428_v14  ;;  %v1504_v3 = vunpack.c.l.b16 %v1429_v37 }
 0x17d   : > { %v1313_v48 = vmax.f32 %v1311_v54, %v1312_v35  ;;  %v1308_v59 = vmax.f32 %v1306_v49, %v1307_v25  ;;  %vm1547_vm2 = vcmask 1047559   ;;  %v1505_v7 = vunpack.c.l.b16 %v1430_v55 }
 0x17e   : > { %v1506_v61 = vunpack.c.l.b16 %v1431_v41  ;;  %v1507_v33 = vunpack.c.l.b16 %v1432_v60  ;;  %v1508_v58 = vunpack.c.l.b16 %v1433_v40  ;;  %v1509_v56 = vunpack.c.l.b16 %v1434_v39 }
 0x17f   : > { %v1314_v18 = vrot.slane %v1313_v48, 1  ;;  %v1442_v45 = vpack.c.bf16 %v1308_v59, %v1308_v59  ;;  %v1510_v36 = vunpack.c.l.b16 %v1435_v0  ;;  %v1511_v44 = vunpack.c.l.b16 %v1436_v16 }
 0x180   : > { %v1512_v54 = vunpack.c.l.b16 %v1437_v32  ;;  %v1513_v38 = vunpack.c.l.b16 %v1438_v5  ;;  %v1514_v57 = vunpack.c.l.b16 %v1439_v27  ;;  %v1515_v26 = vunpack.c.l.b16 %v1440_v10 }
 0x181   : > { %v1315_v43 = vmax.f32 %v1313_v48, %v1314_v18  ;;  %v1516_v53 = vunpack.c.l.b16 %v1441_v6  ;;  %v1517_v49 = vunpack.c.l.b16 %v1442_v45  ;;  %v1536_v14 = vsel %vm1535_vm11, %v1504_v3, %v1503_v29 }
 0x182   : > { %v1549_v37 = vsel %vm1535_vm11, %v1512_v54, %v1511_v44  ;;  %v4473_v55 = vrot.slane %v3848_v47, 1  ;;  %v1538_v60 = vsel %vm1537_vm12, %v1505_v7, %v1536_v14  ;;  %v1356_v35 = vrot.slane %v3909_v21, 1 }
 0x183   : > { %v1443_v17 = vpack.c.bf16 %v1315_v43, %v1315_v43  ;;  %v1550_v40 = vsel %vm1537_vm12, %v1513_v38, %v1549_v37  ;;  %v4474_v39 = vrot.slane %v3881_v34, 2  ;;  %v1540_v16 = vsel %vm1539_vm13, %v1506_v61, %v1538_v60 }
 0x184   : > { %v1343_v41 = vmax.f32 %v3848_v47, %v4473_v55  ;;  %v1551_v32 = vsel %vm1539_vm13, %v1514_v57, %v1550_v40  ;;  %v4475_v48 = vcombine.high %v3857_v50, %v3857_v50  ;;  %v1542_v5 = vsel %vm1541_vm14, %v1507_v33, %v1540_v16 }
 0x185   : > { %v1362_v25 = vmax.f32 %v3881_v34, %v4474_v39  ;;  %v1518_v0 = vunpack.c.l.b16 %v1443_v17  ;;  %v1552_v27 = vsel %vm1541_vm14, %v1515_v26, %v1551_v32  ;;  %v1357_v10 = vmax.f32 %v3909_v21, %v1356_v35 }
 0x186   : > { %v1365_v47 = vsel %vm1203_vm9, %v4475_v48, -inf  ;;  %v1544_v6 = vsel %vm1543_vm15, %v1508_v58, %v1542_v5  ;;  %v1553_v34 = vsel %vm1543_vm15, %v1516_v53, %v1552_v27  ;;  %v1399_v3 = vmax.f32 %v3932_v31, %v1398_v23 }
 0x187   : > { %v1363_v59 = vrot.slane %v1362_v25, 1  ;;  %v1366_v29 = vrot.slane %v1365_v47, 4  ;;  %v1546_v50 = vsel %vm1545_vm0, %v1509_v56, %v1544_v6  ;;  %v1554_v18 = vsel %vm1545_vm0, %v1517_v49, %v1553_v34 }
 0x188   : > { %v1412_v61 = vrot.slane %v3957_v20, 1  ;;  %v1548_v33 = vsel %vm1547_vm2, %v1510_v36, %v1546_v50  ;;  %v1555_v21 = vsel %vm1547_vm2, %v1518_v0, %v1554_v18  ;;  %v1418_v58 = vmax.f32 %v3948_v1, %v1417_v51  ;;  %v2865_v50 = vld [vmem:[%s4476_s9] ss:$0 sm:$0xff] }
 0x189   : > { %v1364_v7 = vmax.f32 %v1362_v25, %v1363_v59  ;;  %v1367_v45 = vmax.f32 %v1365_v47, %v1366_v29  ;;  %v1570_v43 = vpack.c.b16 %v1555_v21, %v1548_v33  ;;  %v1423_v31 = vmax.f32 %v3930_v4, %v1422_v22 }
 0x18a   : > { %v1413_v44 = vmax.f32 %v3957_v20, %v1412_v61  ;;  %v1447_v23 = vpack.c.bf16 %v1343_v41, %v1343_v41  ;;  %v1419_v54 = vrot.slane %v1418_v58, 1  ;;  %v1448_v36 = vpack.c.bf16 %v3942_v46, %v3942_v46 }
 0x18b   : > { %v1368_v56 = vrot.slane %v1367_v45, 2  ;;  %v1449_v38 = vpack.c.bf16 %v1357_v10, %v1357_v10  ;;  %v1529_v57 = vunpack.c.l.b16 %v1454_v62  ;;  %3034 = vmatprep.mubr.msk.bf16.mxu1 %vm706_vm1, %v1570_v43  ;;  %v1424_v1 = vrot.slane %v1423_v31, 2 }
 0x18c   : > { %v1450_v51 = vpack.c.bf16 %v1364_v7, %v1364_v7  ;;  %v1455_v20 = vpack.c.bf16 %v1399_v3, %v1399_v3  ;;  %v1456_v26 = vpack.c.bf16 %v3966_v15, %v3966_v15  ;;  %v1420_v22 = vmax.f32 %v1418_v58, %v1419_v54 }
 0x18d   : > { %v1369_v4 = vmax.f32 %v1367_v45, %v1368_v56  ;;  %v1522_v53 = vunpack.c.l.b16 %v1447_v23  ;;  %v1425_v49 = vmax.f32 %v1423_v31, %v1424_v1  ;;  %v1457_v17 = vpack.c.bf16 %v1413_v44, %v1413_v44 }
 0x18e   : > { %v1523_v14 = vunpack.c.l.b16 %v1448_v36  ;;  %v1530_v46 = vunpack.c.l.b16 %v1455_v20  ;;  %v1458_v55 = vpack.c.bf16 %v1420_v22, %v1420_v22  ;;  %v1524_v41 = vunpack.c.l.b16 %v1449_v38 }
 0x18f   : > { %v1370_v37 = vrot.slane %v1369_v4, 1  ;;  %v1556_v19 = vsel %vm1535_vm11, %v3895_v52, %v3872_v24  ;;  %v1426_v62 = vrot.slane %v1425_v49, 1  ;;  %v1525_v60 = vunpack.c.l.b16 %v1450_v51 }
 0x190   : > { %v1557_v40 = vsel %vm1537_vm12, %v3891_v63, %v1556_v19  ;;  %v1563_v15 = vsel %vm1535_vm11, %v3954_v42, %v3946_v2  ;;  %v1531_v35 = vunpack.c.l.b16 %v1456_v26  ;;  %v1532_v32 = vunpack.c.l.b16 %v1457_v17 }
 0x191   : > { %v1371_v39 = vmax.f32 %v1369_v4, %v1370_v37  ;;  %v1558_v25 = vsel %vm1539_vm13, %v1522_v53, %v1557_v40  ;;  %v1564_v0 = vsel %vm1537_vm12, %v1529_v57, %v1563_v15  ;;  %v1427_v16 = vmax.f32 %v1425_v49, %v1426_v62 }
 0x192   : > { %v1559_v48 = vsel %vm1541_vm14, %v1523_v14, %v1558_v25  ;;  %v1565_v24 = vsel %vm1539_vm13, %v1530_v46, %v1564_v0  ;;  %v1533_v47 = vunpack.c.l.b16 %v1458_v55 }
 0x193   : > { %v1451_v52 = vpack.c.bf16 %v1371_v39, %v1371_v39  ;;  %v1560_v63 = vsel %vm1543_vm15, %v1524_v41, %v1559_v48  ;;  %v1566_v5 = vsel %vm1541_vm14, %v1531_v35, %v1565_v24  ;;  %v1459_v27 = vpack.c.bf16 %v1427_v16, %v1427_v16 }
 0x194   : > { %v1561_v2 = vsel %vm1545_vm0, %v1525_v60, %v1560_v63  ;;  %v1567_v42 = vsel %vm1543_vm15, %v1532_v32, %v1566_v5 }
 0x195   : > { %v1526_v10 = vunpack.c.l.b16 %v1451_v52  ;;  %v1568_v59 = vsel %vm1545_vm0, %v1533_v47, %v1567_v42  ;;  %v1534_v6 = vunpack.c.l.b16 %v1459_v27 }
 0x197   : > { %v1562_v34 = vsel %vm1547_vm2, %v1526_v10, %v1561_v2  ;;  %v1569_v29 = vsel %vm1547_vm2, %v1534_v6, %v1568_v59 }
 0x198   : > { %v1571_v3 = vpack.c.b16 %v1569_v29, %v1562_v34 }
 0x19a   : > { %3035 = vmatmul.mubr.msk.bf16.vlgmr.msra.gmra.mxu1 %vm706_vm1, %v1571_v3 }
 0x25a   : > { %v3036_v18 = vpop.f32.mrf.mxu1 }
 0x25b   : > { %v4073_v7 = vadd.f32 %v3036_v18, %v2865_v50 }
 0x25c   : > { %v1624_v61 = vpop.f32.mrf.mxu1 }
 0x25d   : > { %v4075_v33 = vadd.f32 %v2865_v50, %v1624_v61  ;;  %1642 = sbr.rel (%p2870_p10) target bundleno = 612 (0x264), region = 162 }
 0x25e   : > { %v3037_v21 = vpop.f32.mrf.mxu1 }
 0x25f   : > { %v4077_v45 = vadd.f32 %v3037_v21, %v2865_v50 }
 0x260   : > { %v1627_v58 = vpop.f32.mrf.mxu1 }
 0x261   : > { %v4079_v43 = vadd.f32 %v2865_v50, %v1627_v58 }
 0x262   : > { %vm1643_vm3 = vcmask 517120   ;;  %v3335_v44 = vmov 0.0  }
 0x263   : > { %1644 = vst.msk [vmem:[#allocation2] sm:$0x3] %vm1643_vm3, %v3335_v44 }
 0x264 PF: > { %vm1646_vm4 = vcmask 523264   ;;  %v1672_v31 = vunpack.c.l.bf16 %v3575_v9  ;;  %v1673_v23 = vunpack.c.h.bf16 %v3575_v9  ;;  %s4477_s8 = sld [smem:[#allocation22_spill]]  ;;  %v1674_v9 = vunpack.c.l.bf16 %v3581_v11  ;;  %s2876_s28 = sshll.u32 %s3313_s20, 4 }
 0x265   : > { %v1647_v56 = vsel %vm1646_vm4, %v4075_v33, 0.0  ;;  %v1648_v54 = vsel %vm1646_vm4, %v4079_v43, 0.0  ;;  %v1656_v36 = vsel %vm1646_vm4, %v4073_v7, 0.0  ;;  %v1657_v38 = vsel %vm1646_vm4, %v4077_v45, 0.0  ;;  %s4478_s18 = sld [smem:[#allocation23_spill]]  ;;  %s2338_s16 = sshra.s32 %s2876_s28, 3 }
 0x266   : > { %v1649_v57 = vadd.f32 %v1648_v54, %v1647_v56  ;;  %v1658_v1 = vadd.f32 %v1657_v38, %v1656_v36  ;;  %v1675_v20 = vunpack.c.h.bf16 %v3581_v11  ;;  %v1688_v4 = vcombine.high %v1672_v31, %v1672_v31  ;;  %s2881_s12 = sshll.u32 %s2338_s16, 2  ;;  %p2882_p11 = scmp.ne.s32.totalorder %s3313_s20, 3 }
 0x267   : > { %v1695_v22 = vrot.slane %v1672_v31, %v3680_v8  ;;  %v1705_v53 = vcombine.high %v1673_v23, %v1673_v23  ;;  %v1712_v49 = vrot.slane %v1673_v23, %v3680_v8  ;;  %v1722_v46 = vcombine.high %v1674_v9, %v1674_v9  ;;  %s2341_s5 = scalar_lea.vmem %s4082_s13, %s2881_s12 [#allocation6]  ;;  %s4479_s26 = sld [smem:[#allocation18_spill]] (!%p2882_p11) }
 0x268   : > { %v1650_v17 = vrot.slane %v1649_v57, 4  ;;  %v1659_v14 = vrot.slane %v1658_v1, 4  ;;  %v4106_v37 = vrot.slane %v1674_v9, %v3680_v8  ;;  %v1702_v11 = vrot.slane %v1688_v4, %v3680_v8  ;;  %s4480_s20 = sld [smem:[#allocation20_spill]] (!%p2882_p11) }
 0x269   : > { %v1703_v55 = vcombine.high %v1695_v22, %v1695_v22  ;;  %v4110_v41 = vrot.slane %v1705_v53, %v3680_v8  ;;  %v1720_v19 = vcombine.high %v1712_v49, %v1712_v49  ;;  %v4113_v40 = vrot.slane %v1722_v46, %v3680_v8  ;;  %s4481_s16 = sld [smem:[#allocation19_spill]] (!%p2882_p11) }
 0x26a   : > { %v3199_v51 = vld [vmem:[%s4477_s8 + $0x8] sm:$0xff]   ;;  %v3200_v26 = vld [vmem:[%s4477_s8] sm:$0xff]   ;;  %v1651_v62 = vadd.f32 %v1650_v17, %v1649_v57  ;;  %v1660_v60 = vadd.f32 %v1659_v14, %v1658_v1  ;;  %v1737_v15 = vcombine.high %v4106_v37, %v4106_v37  ;;  %v1704_v35 = vcombine.high %v1702_v11, %v1702_v11  ;;  %s4482_s9 = sld [smem:[#allocation21_spill]] (!%p2882_p11) }
 0x26b   : > { %3038 = vmatprep.subr.bf16.mxu1 %v3199_v51  ;;  %v1721_v39 = vcombine.high %v4110_v41, %v4110_v41  ;;  %v1739_v25 = vcombine.high %v1675_v20, %v1675_v20  ;;  %v4120_v0 = vrot.slane %v1675_v20, %v3680_v8  ;;  %vm1670_vm5 = vcmask 517120   ;;  %v1645_v23 = vld [vmem:[#allocation2] sm:$0x3] }
 0x26c   : > { %3039 = vmatpush3.bf16.msra.mxu1 %v3199_v51  ;;  %v1652_v16 = vrot.slane %v1651_v62, 2  ;;  %v1661_v32 = vrot.slane %v1660_v60, 2  ;;  %v1738_v48 = vcombine.high %v4113_v40, %v4113_v40  ;;  %v1856_v24 = vsel %vm1203_vm9, %v1695_v22, 0.0 }
 0x26d   : > { %3040 = vmatprep.subr.bf16.mxu1 %v3200_v26  ;;  %v4126_v52 = vrot.slane %v1739_v25, %v3680_v8  ;;  %v1754_v47 = vcombine.high %v4120_v0, %v4120_v0  ;;  %v1857_v63 = vrot.slane %v1856_v24, 4  ;;  %v1863_v5 = vsel %vm1203_vm9, %v1703_v55, 0.0 }
 0x26e   : > { %v1653_v27 = vadd.f32 %v1652_v16, %v1651_v62  ;;  %v1662_v2 = vadd.f32 %v1661_v32, %v1660_v60  ;;  %v1864_v42 = vrot.slane %v1863_v5, 4  ;;  %v1870_v10 = vsel %vm1203_vm9, %v1702_v11, 0.0 }
 0x26f   : > { %v1755_v59 = vcombine.high %v4126_v52, %v4126_v52  ;;  %v1858_v6 = vadd.f32 %v1857_v63, %v1856_v24  ;;  %v1871_v34 = vrot.slane %v1870_v10, 4  ;;  %v1877_v29 = vsel %vm1203_vm9, %v1704_v35, 0.0 }
 0x270   : > { %3041 = vmatpush3.bf16.msra.mxu1 %v3200_v26  ;;  %v1654_v3 = vrot.slane %v1653_v27, 1  ;;  %v1663_v50 = vrot.slane %v1662_v2, 1  ;;  %v1865_v18 = vadd.f32 %v1864_v42, %v1863_v5  ;;  %v1878_v61 = vrot.slane %v1877_v29, 4 }
 0x271   : > { %v1859_v21 = vrot.slane %v1858_v6, 2  ;;  %v1872_v58 = vadd.f32 %v1871_v34, %v1870_v10  ;;  %v1884_v44 = vsel %vm1203_vm9, %v1712_v49, 0.0  ;;  %v1891_v31 = vsel %vm1203_vm9, %v1720_v19, 0.0 }
 0x272   : > { %v1655_v56 = vadd.f32 %v1654_v3, %v1653_v27  ;;  %v1664_v54 = vadd.f32 %v1663_v50, %v1662_v2  ;;  %v1866_v36 = vrot.slane %v1865_v18, 2  ;;  %v1879_v38 = vadd.f32 %v1878_v61, %v1877_v29 }
 0x273   : > { %v1860_v57 = vadd.f32 %v1859_v21, %v1858_v6  ;;  %v1873_v1 = vrot.slane %v1872_v58, 2  ;;  %v1885_v51 = vrot.slane %v1884_v44, 4  ;;  %v1892_v9 = vrot.slane %v1891_v31, 4 }
 0x274   : > { %v1667_v20 = vsel %vm1535_vm11, %v1664_v54, %v1655_v56  ;;  %v1867_v26 = vadd.f32 %v1866_v36, %v1865_v18  ;;  %v1880_v4 = vrot.slane %v1879_v38, 2  ;;  %v1898_v22 = vsel %vm1203_vm9, %v4110_v41, 0.0 }
 0x275   : > { %v1669_v53 = vadd.f32 %v1667_v20, %v1645_v23  ;;  %v1861_v49 = vrot.slane %v1860_v57, 1  ;;  %v1874_v17 = vadd.f32 %v1873_v1, %v1872_v58  ;;  %v1886_v14 = vadd.f32 %v1885_v51, %v1884_v44 }
 0x276   : > { %v1868_v46 = vrot.slane %v1867_v26, 1  ;;  %v1881_v11 = vadd.f32 %v1880_v4, %v1879_v38  ;;  %v1893_v55 = vadd.f32 %v1892_v9, %v1891_v31  ;;  %v1899_v19 = vrot.slane %v1898_v22, 4 }
 0x277   : > { %1671 = vst.msk [vmem:[#allocation2] sm:$0x3] %vm1670_vm5, %v1669_v53  ;;  %v4141_v62 = vadd.f32 %v1861_v49, %v1860_v57  ;;  %v1875_v60 = vrot.slane %v1874_v17, 1  ;;  %v1887_v35 = vrot.slane %v1886_v14, 2  ;;  %v1905_v25 = vsel %vm1203_vm9, %v1721_v39, 0.0 }
 0x278   : > { %v4144_v16 = vadd.f32 %v1868_v46, %v1867_v26  ;;  %v1882_v32 = vrot.slane %v1881_v11, 1  ;;  %v1894_v41 = vrot.slane %v1893_v55, 2  ;;  %v1900_v24 = vadd.f32 %v1899_v19, %v1898_v22 }
 0x279   : > { %v4146_v63 = vadd.f32 %v1875_v60, %v1874_v17  ;;  %v1888_v5 = vadd.f32 %v1887_v35, %v1886_v14  ;;  %v1906_v27 = vrot.slane %v1905_v25, 4  ;;  %v1912_v2 = vsel %vm1203_vm9, %v4106_v37, 0.0 }
 0x27a   : > { %v1883_v42 = vadd.f32 %v1882_v32, %v1881_v11  ;;  %v1895_v10 = vadd.f32 %v1894_v41, %v1893_v55  ;;  %v1901_v6 = vrot.slane %v1900_v24, 2  ;;  %v1913_v34 = vrot.slane %v1912_v2, 4 }
 0x27b   : > { %v1889_v29 = vrot.slane %v1888_v5, 1  ;;  %v1907_v3 = vadd.f32 %v1906_v27, %v1905_v25  ;;  %v1919_v39 = vsel %vm1203_vm9, %v1737_v15, 0.0  ;;  %v1926_v50 = vsel %vm1203_vm9, %v4113_v40, 0.0 }
 0x27c   : > { %v1896_v18 = vrot.slane %v1895_v10, 1  ;;  %v1902_v61 = vadd.f32 %v1901_v6, %v1900_v24  ;;  %v1914_v21 = vadd.f32 %v1913_v34, %v1912_v2  ;;  %v1920_v58 = vrot.slane %v1919_v39, 4 }
 0x27d   : > { %v1890_v44 = vadd.f32 %v1889_v29, %v1888_v5  ;;  %v1908_v31 = vrot.slane %v1907_v3, 2  ;;  %v1927_v23 = vrot.slane %v1926_v50, 4  ;;  %v1933_v56 = vsel %vm1203_vm9, %v1738_v48, 0.0 }
 0x27e   : > { %v1897_v54 = vadd.f32 %v1896_v18, %v1895_v10  ;;  %v1903_v36 = vrot.slane %v1902_v61, 1  ;;  %v1915_v37 = vrot.slane %v1914_v21, 2  ;;  %v1921_v38 = vadd.f32 %v1920_v58, %v1919_v39 }
 0x27f   : > { %v1909_v15 = vadd.f32 %v1908_v31, %v1907_v3  ;;  %v1928_v57 = vadd.f32 %v1927_v23, %v1926_v50  ;;  %v1934_v1 = vrot.slane %v1933_v56, 4  ;;  %v1940_v51 = vsel %vm1203_vm9, %v4120_v0, 0.0 }
 0x280   : > { %v1904_v9 = vadd.f32 %v1903_v36, %v1902_v61  ;;  %v1916_v20 = vadd.f32 %v1915_v37, %v1914_v21  ;;  %v1922_v26 = vrot.slane %v1921_v38, 2  ;;  %v1941_v4 = vrot.slane %v1940_v51, 4 }
 0x281   : > { %v1910_v22 = vrot.slane %v1909_v15, 1  ;;  %v1929_v53 = vrot.slane %v1928_v57, 2  ;;  %v1935_v49 = vadd.f32 %v1934_v1, %v1933_v56  ;;  %v1947_v40 = vsel %vm1203_vm9, %v1754_v47, 0.0 }
 0x282   : > { %v1917_v48 = vrot.slane %v1916_v20, 1  ;;  %v1923_v17 = vadd.f32 %v1922_v26, %v1921_v38  ;;  %v1942_v14 = vadd.f32 %v1941_v4, %v1940_v51  ;;  %v1948_v46 = vrot.slane %v1947_v40, 4 }
 0x283   : > { %v1911_v11 = vadd.f32 %v1910_v22, %v1909_v15  ;;  %v1930_v55 = vadd.f32 %v1929_v53, %v1928_v57  ;;  %v1936_v19 = vrot.slane %v1935_v49, 2  ;;  %v1954_v60 = vsel %vm1203_vm9, %v4126_v52, 0.0 }
 0x284   : > { %v1918_v35 = vadd.f32 %v1917_v48, %v1916_v20  ;;  %v1924_v25 = vrot.slane %v1923_v17, 1  ;;  %v1943_v32 = vrot.slane %v1942_v14, 2  ;;  %v1949_v41 = vadd.f32 %v1948_v46, %v1947_v40 }
 0x285   : > { %v1931_v24 = vrot.slane %v1930_v55, 1  ;;  %v1937_v5 = vadd.f32 %v1936_v19, %v1935_v49  ;;  %v1955_v27 = vrot.slane %v1954_v60, 4  ;;  %v1961_v0 = vsel %vm1203_vm9, %v1755_v59, 0.0 }
 0x286   : > { %v1925_v47 = vadd.f32 %v1924_v25, %v1923_v17  ;;  %v1944_v2 = vadd.f32 %v1943_v32, %v1942_v14  ;;  %v1950_v10 = vrot.slane %v1949_v41, 2  ;;  %v1962_v6 = vrot.slane %v1961_v0, 4 }
 0x287   : > { %v1932_v34 = vadd.f32 %v1931_v24, %v1930_v55  ;;  %v1938_v29 = vrot.slane %v1937_v5, 1  ;;  %v1956_v3 = vadd.f32 %v1955_v27, %v1954_v60  ;;  %v2081_v39 = vmul.f32 0.5, %v4141_v62 }
 0x288   : > { %v1945_v50 = vrot.slane %v1944_v2, 1  ;;  %v1951_v18 = vadd.f32 %v1950_v10, %v1949_v41  ;;  %v1963_v61 = vadd.f32 %v1962_v6, %v1961_v0  ;;  %v2082_v21 = vmul.f32 0.5, %v4144_v16 }
 0x289   : > { %v1939_v58 = vadd.f32 %v1938_v29, %v1937_v5  ;;  %v1957_v31 = vrot.slane %v1956_v3, 2  ;;  %v2083_v52 = vmul.f32 0.5, %v4146_v63  ;;  %v2084_v23 = vmul.f32 0.5, %v1883_v42 }
 0x28a   : > { %v1946_v59 = vadd.f32 %v1945_v50, %v1944_v2  ;;  %v1952_v56 = vrot.slane %v1951_v18, 1  ;;  %v1964_v36 = vrot.slane %v1963_v61, 2  ;;  %v2085_v37 = vmul.f32 0.5, %v1890_v44 }
 0x28b   : > { %v1958_v38 = vadd.f32 %v1957_v31, %v1956_v3  ;;  %v2086_v15 = vmul.f32 0.5, %v1897_v54  ;;  %v2087_v57 = vmul.f32 0.5, %v1904_v9  ;;  %v2088_v1 = vmul.f32 0.5, %v1911_v11 }
 0x28c   : > { %v1953_v51 = vadd.f32 %v1952_v56, %v1951_v18  ;;  %v1965_v62 = vadd.f32 %v1964_v36, %v1963_v61  ;;  %v2089_v20 = vmul.f32 0.5, %v1918_v35  ;;  %v2090_v26 = vmul.f32 0.5, %v1925_v47 }
 0x28d   : > { %v1959_v4 = vrot.slane %v1958_v38, 1  ;;  %v2091_v22 = vmul.f32 0.5, %v1932_v34  ;;  %v2092_v16 = vmul.f32 0.5, %v1939_v58  ;;  %v2093_v53 = vmul.f32 0.5, %v1946_v59 }
 0x28e   : > { %v1966_v49 = vrot.slane %v1965_v62, 1  ;;  %v2094_v40 = vmul.f32 0.5, %v1953_v51  ;;  %v2113_v63 = vpack.c.bf16 %v2081_v39, %v2081_v39  ;;  %v2114_v42 = vpack.c.bf16 %v2082_v21, %v2082_v21 }
 0x28f   : > { %v1960_v48 = vadd.f32 %v1959_v4, %v1958_v38  ;;  %v2115_v17 = vpack.c.bf16 %v2083_v52, %v2083_v52  ;;  %v2116_v14 = vpack.c.bf16 %v2084_v23, %v2084_v23  ;;  %v2117_v44 = vpack.c.bf16 %v2085_v37, %v2085_v37 }
 0x290   : > { %v1967_v46 = vadd.f32 %v1966_v49, %v1965_v62  ;;  %v2118_v54 = vpack.c.bf16 %v2086_v15, %v2086_v15  ;;  %v2119_v9 = vpack.c.bf16 %v2087_v57, %v2087_v57  ;;  %v2120_v11 = vpack.c.bf16 %v2088_v1, %v2088_v1 }
 0x291   : > { %v2095_v55 = vmul.f32 0.5, %v1960_v48  ;;  %v2121_v19 = vpack.c.bf16 %v2089_v20, %v2089_v20  ;;  %v2122_v60 = vpack.c.bf16 %v2090_v26, %v2090_v26  ;;  %v2123_v35 = vpack.c.bf16 %v2091_v22, %v2091_v22 }
 0x292   : > { %v2096_v25 = vmul.f32 0.5, %v1967_v46  ;;  %v2124_v32 = vpack.c.bf16 %v2092_v16, %v2092_v16  ;;  %v2125_v41 = vpack.c.bf16 %v2093_v53, %v2093_v53  ;;  %v2126_v24 = vpack.c.bf16 %v2094_v40, %v2094_v40 }
 0x293   : > { %v2127_v5 = vpack.c.bf16 %v2095_v55, %v2095_v55  ;;  %v2188_v27 = vunpack.c.l.b16 %v2113_v63  ;;  %v2189_v0 = vunpack.c.l.b16 %v2114_v42  ;;  %v2190_v47 = vunpack.c.l.b16 %v2115_v17 }
 0x294   : > { %v2128_v2 = vpack.c.bf16 %v2096_v25, %v2096_v25  ;;  %v2191_v10 = vunpack.c.l.b16 %v2116_v14  ;;  %v2192_v6 = vunpack.c.l.b16 %v2117_v44  ;;  %v2193_v34 = vunpack.c.l.b16 %v2118_v54 }
 0x295   : > { %v2194_v29 = vunpack.c.l.b16 %v2119_v9  ;;  %v2195_v3 = vunpack.c.l.b16 %v2120_v11  ;;  %v2196_v39 = vunpack.c.l.b16 %v2121_v19  ;;  %v2197_v50 = vunpack.c.l.b16 %v2122_v60 }
 0x296   : > { %v2198_v18 = vunpack.c.l.b16 %v2123_v35  ;;  %v2199_v61 = vunpack.c.l.b16 %v2124_v32  ;;  %v2200_v21 = vunpack.c.l.b16 %v2125_v41  ;;  %v2201_v58 = vunpack.c.l.b16 %v2126_v24 }
 0x297   : > { %v2202_v31 = vunpack.c.l.b16 %v2127_v5  ;;  %v2203_v52 = vunpack.c.l.b16 %v2128_v2  ;;  %v2220_v23 = vsel %vm1535_vm11, %v2189_v0, %v2188_v27  ;;  %v2227_v59 = vsel %vm1535_vm11, %v2197_v50, %v2196_v39 }
 0x298   : > { %v2221_v56 = vsel %vm1537_vm12, %v2190_v47, %v2220_v23  ;;  %v2228_v36 = vsel %vm1537_vm12, %v2198_v18, %v2227_v59  ;;  %v1676_v37 = vunpack.c.l.bf16 %v3587_v12  ;;  %v1677_v38 = vunpack.c.h.bf16 %v3587_v12 }
 0x299   : > { %v2222_v15 = vsel %vm1539_vm13, %v2191_v10, %v2221_v56  ;;  %v2229_v57 = vsel %vm1539_vm13, %v2199_v61, %v2228_v36  ;;  %v1678_v1 = vunpack.c.l.bf16 %v3592_v13  ;;  %v1679_v51 = vunpack.c.h.bf16 %v3592_v13 }
 0x29a   : > { %v2223_v62 = vsel %vm1541_vm14, %v2192_v6, %v2222_v15  ;;  %v2230_v20 = vsel %vm1541_vm14, %v2200_v21, %v2229_v57  ;;  %v1756_v26 = vcombine.high %v1676_v37, %v1676_v37  ;;  %v1763_v4 = vrot.slane %v1676_v37, %v3680_v8 }
 0x29b   : > { %v2224_v22 = vsel %vm1543_vm15, %v2193_v34, %v2223_v62  ;;  %v2231_v16 = vsel %vm1543_vm15, %v2201_v58, %v2230_v20  ;;  %v1773_v12 = vcombine.high %v1677_v38, %v1677_v38  ;;  %v1780_v53 = vrot.slane %v1677_v38, %v3680_v8 }
 0x29c   : > { %v2225_v49 = vsel %vm1545_vm0, %v2194_v29, %v2224_v22  ;;  %v2232_v40 = vsel %vm1545_vm0, %v2202_v31, %v2231_v16  ;;  %v1770_v13 = vrot.slane %v1756_v26, %v3680_v8  ;;  %v1771_v63 = vcombine.high %v1763_v4, %v1763_v4 }
 0x29d   : > { %v2226_v42 = vsel %vm1547_vm2, %v2195_v3, %v2225_v49  ;;  %v2233_v48 = vsel %vm1547_vm2, %v2203_v52, %v2232_v40  ;;  %v1787_v17 = vrot.slane %v1773_v12, %v3680_v8  ;;  %v1790_v46 = vcombine.high %v1678_v1, %v1678_v1 }
 0x29e   : > { %v2248_v14 = vpack.c.b16 %v2233_v48, %v2226_v42  ;;  %v1772_v44 = vcombine.high %v1770_v13, %v1770_v13  ;;  %v1807_v54 = vcombine.high %v1679_v51, %v1679_v51  ;;  %v1968_v9 = vsel %vm1203_vm9, %v1763_v4, 0.0 }
 0x29f   : > { %v1788_v11 = vcombine.high %v1780_v53, %v1780_v53  ;;  %v1797_v55 = vrot.slane %v1678_v1, %v3680_v8  ;;  %v1969_v19 = vrot.slane %v1968_v9, 4  ;;  %v1975_v60 = vsel %vm1203_vm9, %v1771_v63, 0.0 }
 0x2a0   : > { %3042 = vmatprep.mubr.msk.bf16.mxu1 %vm706_vm1, %v2248_v14  ;;  %v1789_v35 = vcombine.high %v1787_v17, %v1787_v17  ;;  %v4202_v25 = vrot.slane %v1679_v51, %v3680_v8  ;;  %v1976_v32 = vrot.slane %v1975_v60, 4  ;;  %v1982_v41 = vsel %vm1203_vm9, %v1770_v13, 0.0 }
 0x2a1   : > { %v1804_v24 = vrot.slane %v1790_v46, %v3680_v8  ;;  %v1970_v5 = vadd.f32 %v1969_v19, %v1968_v9  ;;  %v1983_v27 = vrot.slane %v1982_v41, 4  ;;  %v1989_v0 = vsel %vm1203_vm9, %v1772_v44, 0.0 }
 0x2a2   : > { %v4208_v47 = vrot.slane %v1807_v54, %v3680_v8  ;;  %v1977_v2 = vadd.f32 %v1976_v32, %v1975_v60  ;;  %v1990_v10 = vrot.slane %v1989_v0, 4  ;;  %v1996_v6 = vsel %vm1203_vm9, %v1780_v53, 0.0 }
 0x2a3   : > { %v1971_v34 = vrot.slane %v1970_v5, 2  ;;  %v1984_v29 = vadd.f32 %v1983_v27, %v1982_v41  ;;  %v1997_v3 = vrot.slane %v1996_v6, 4  ;;  %v2003_v39 = vsel %vm1203_vm9, %v1788_v11, 0.0 }
 0x2a4   : > { %v1978_v50 = vrot.slane %v1977_v2, 2  ;;  %v1991_v18 = vadd.f32 %v1990_v10, %v1989_v0  ;;  %v2004_v61 = vrot.slane %v2003_v39, 4  ;;  %v2010_v21 = vsel %vm1203_vm9, %v1787_v17, 0.0 }
 0x2a5   : > { %v1972_v58 = vadd.f32 %v1971_v34, %v1970_v5  ;;  %v1985_v31 = vrot.slane %v1984_v29, 2  ;;  %v1998_v52 = vadd.f32 %v1997_v3, %v1996_v6  ;;  %v2011_v23 = vrot.slane %v2010_v21, 4 }
 0x2a6   : > { %v1979_v8 = vadd.f32 %v1978_v50, %v1977_v2  ;;  %v1992_v59 = vrot.slane %v1991_v18, 2  ;;  %v2005_v56 = vadd.f32 %v2004_v61, %v2003_v39  ;;  %v2017_v36 = vsel %vm1203_vm9, %v1789_v35, 0.0 }
 0x2a7   : > { %v1973_v37 = vrot.slane %v1972_v58, 1  ;;  %v1986_v38 = vadd.f32 %v1985_v31, %v1984_v29  ;;  %v1999_v15 = vrot.slane %v1998_v52, 2  ;;  %v2012_v57 = vadd.f32 %v2011_v23, %v2010_v21 }
 0x2a8   : > { %v1980_v1 = vrot.slane %v1979_v8, 1  ;;  %v1993_v51 = vadd.f32 %v1992_v59, %v1991_v18  ;;  %v2006_v62 = vrot.slane %v2005_v56, 2  ;;  %v2018_v20 = vrot.slane %v2017_v36, 4 }
 0x2a9   : > { %v1805_v26 = vcombine.high %v1797_v55, %v1797_v55  ;;  %v1987_v4 = vrot.slane %v1986_v38, 1  ;;  %v2000_v22 = vadd.f32 %v1999_v15, %v1998_v52  ;;  %v2013_v16 = vrot.slane %v2012_v57, 2 }
 0x2aa   : > { %v1822_v12 = vcombine.high %v4202_v25, %v4202_v25  ;;  %v1994_v53 = vrot.slane %v1993_v51, 1  ;;  %v2007_v49 = vadd.f32 %v2006_v62, %v2005_v56  ;;  %v2019_v40 = vadd.f32 %v2018_v20, %v2017_v36 }
 0x2ab   : > { %v1806_v13 = vcombine.high %v1804_v24, %v1804_v24  ;;  %v1823_v63 = vcombine.high %v4208_v47, %v4208_v47  ;;  %v2001_v42 = vrot.slane %v2000_v22, 1  ;;  %v2024_v48 = vsel %vm1203_vm9, %v1797_v55, 0.0 }
 0x2ac   : > { %v4219_v17 = vadd.f32 %v1973_v37, %v1972_v58  ;;  %v4221_v14 = vadd.f32 %v1980_v1, %v1979_v8  ;;  %v2020_v44 = vrot.slane %v2019_v40, 2  ;;  %v2025_v46 = vrot.slane %v2024_v48, 4 }
 0x2ad   : > { %v1988_v54 = vadd.f32 %v1987_v4, %v1986_v38  ;;  %v2014_v9 = vadd.f32 %v2013_v16, %v2012_v57  ;;  %v2031_v11 = vsel %vm1203_vm9, %v1805_v26, 0.0  ;;  %v2038_v19 = vsel %vm1203_vm9, %v1804_v24, 0.0 }
 0x2ae   : > { %v1995_v60 = vadd.f32 %v1994_v53, %v1993_v51  ;;  %v2008_v35 = vrot.slane %v2007_v49, 1  ;;  %v2026_v32 = vadd.f32 %v2025_v46, %v2024_v48  ;;  %v2032_v41 = vrot.slane %v2031_v11, 4 }
 0x2af   : > { %v2002_v5 = vadd.f32 %v2001_v42, %v2000_v22  ;;  %v2039_v27 = vrot.slane %v2038_v19, 4  ;;  %v2045_v55 = vsel %vm1203_vm9, %v1806_v13, 0.0  ;;  %v2052_v0 = vsel %vm1203_vm9, %v4202_v25, 0.0 }
 0x2b0   : > { %v2021_v2 = vadd.f32 %v2020_v44, %v2019_v40  ;;  %v2027_v10 = vrot.slane %v2026_v32, 2  ;;  %v2033_v6 = vadd.f32 %v2032_v41, %v2031_v11  ;;  %v2046_v34 = vrot.slane %v2045_v55, 4 }
 0x2b1   : > { %v2040_v29 = vadd.f32 %v2039_v27, %v2038_v19  ;;  %v2053_v3 = vrot.slane %v2052_v0, 4  ;;  %v2059_v39 = vsel %vm1203_vm9, %v1822_v12, 0.0  ;;  %v2066_v24 = vsel %vm1203_vm9, %v4208_v47, 0.0 }
 0x2b2   : > { %v2015_v50 = vrot.slane %v2014_v9, 1  ;;  %v2028_v18 = vadd.f32 %v2027_v10, %v2026_v32  ;;  %v2034_v61 = vrot.slane %v2033_v6, 2  ;;  %v2047_v21 = vadd.f32 %v2046_v34, %v2045_v55 }
 0x2b3   : > { %v2041_v58 = vrot.slane %v2040_v29, 2  ;;  %v2054_v31 = vadd.f32 %v2053_v3, %v2052_v0  ;;  %v2060_v52 = vrot.slane %v2059_v39, 4  ;;  %v2067_v23 = vrot.slane %v2066_v24, 4 }
 0x2b4   : > { %v2022_v25 = vrot.slane %v2021_v2, 1  ;;  %v2035_v8 = vadd.f32 %v2034_v61, %v2033_v6  ;;  %v2048_v59 = vrot.slane %v2047_v21, 2  ;;  %v2073_v56 = vsel %vm1203_vm9, %v1823_v63, 0.0 }
 0x2b5   : > { %v2042_v36 = vadd.f32 %v2041_v58, %v2040_v29  ;;  %v2055_v37 = vrot.slane %v2054_v31, 2  ;;  %v2061_v38 = vadd.f32 %v2060_v52, %v2059_v39  ;;  %v2068_v15 = vadd.f32 %v2067_v23, %v2066_v24 }
 0x2b6   : > { %v2029_v57 = vrot.slane %v2028_v18, 1  ;;  %v2036_v1 = vrot.slane %v2035_v8, 1  ;;  %v2049_v47 = vadd.f32 %v2048_v59, %v2047_v21  ;;  %v2074_v51 = vrot.slane %v2073_v56, 4 }
 0x2b7   : > { %v2043_v62 = vrot.slane %v2042_v36, 1  ;;  %v2056_v20 = vadd.f32 %v2055_v37, %v2054_v31  ;;  %v2062_v26 = vrot.slane %v2061_v38, 2  ;;  %v2069_v4 = vrot.slane %v2068_v15, 2 }
 0x2b8   : > { %v2009_v22 = vadd.f32 %v2008_v35, %v2007_v49  ;;  %v2016_v16 = vadd.f32 %v2015_v50, %v2014_v9  ;;  %v2050_v12 = vrot.slane %v2049_v47, 1  ;;  %v2075_v53 = vadd.f32 %v2074_v51, %v2073_v56 }
 0x2b9   : > { %v2023_v40 = vadd.f32 %v2022_v25, %v2021_v2  ;;  %v2057_v13 = vrot.slane %v2056_v20, 1  ;;  %v2063_v42 = vadd.f32 %v2062_v26, %v2061_v38  ;;  %v2070_v63 = vadd.f32 %v2069_v4, %v2068_v15 }
 0x2ba   : > { %v2030_v48 = vadd.f32 %v2029_v57, %v2028_v18  ;;  %v2037_v44 = vadd.f32 %v2036_v1, %v2035_v8  ;;  %v2044_v46 = vadd.f32 %v2043_v62, %v2042_v36  ;;  %v2076_v11 = vrot.slane %v2075_v53, 2 }
 0x2bb   : > { %v2051_v19 = vadd.f32 %v2050_v12, %v2049_v47  ;;  %v2058_v32 = vadd.f32 %v2057_v13, %v2056_v20  ;;  %v2064_v41 = vrot.slane %v2063_v42, 1  ;;  %v2071_v27 = vrot.slane %v2070_v63, 1 }
 0x2bc   : > { %v2077_v55 = vadd.f32 %v2076_v11, %v2075_v53  ;;  %v2097_v0 = vmul.f32 0.5, %v4219_v17  ;;  %v2098_v49 = vmul.f32 0.5, %v4221_v14  ;;  %v2099_v9 = vmul.f32 0.5, %v1988_v54 }
 0x2bd   : > { %v2065_v35 = vadd.f32 %v2064_v41, %v2063_v42  ;;  %v2072_v10 = vadd.f32 %v2071_v27, %v2070_v63  ;;  %v2100_v2 = vmul.f32 0.5, %v1995_v60  ;;  %v2101_v6 = vmul.f32 0.5, %v2002_v5 }
 0x2be   : > { %v2078_v34 = vrot.slane %v2077_v55, 1  ;;  %v2105_v29 = vmul.f32 0.5, %v2030_v48  ;;  %v2106_v3 = vmul.f32 0.5, %v2037_v44  ;;  %v2107_v39 = vmul.f32 0.5, %v2044_v46 }
 0x2bf   : > { %v2102_v24 = vmul.f32 0.5, %v2009_v22  ;;  %v2103_v50 = vmul.f32 0.5, %v2016_v16  ;;  %v2108_v18 = vmul.f32 0.5, %v2051_v19  ;;  %v2109_v61 = vmul.f32 0.5, %v2058_v32 }
 0x2c0   : > { %v2079_v21 = vadd.f32 %v2078_v34, %v2077_v55  ;;  %v2110_v58 = vmul.f32 0.5, %v2065_v35  ;;  %v2129_v31 = vpack.c.bf16 %v2097_v0, %v2097_v0  ;;  %v2130_v52 = vpack.c.bf16 %v2098_v49, %v2098_v49 }
 0x2c1   : > { %v2104_v17 = vmul.f32 0.5, %v2023_v40  ;;  %v2111_v23 = vmul.f32 0.5, %v2072_v10  ;;  %v2131_v14 = vpack.c.bf16 %v2099_v9, %v2099_v9  ;;  %v2132_v54 = vpack.c.bf16 %v2100_v2, %v2100_v2 }
 0x2c2   : > { %v2112_v25 = vmul.f32 0.5, %v2079_v21  ;;  %v2137_v8 = vpack.c.bf16 %v2105_v29, %v2105_v29  ;;  %v2138_v60 = vpack.c.bf16 %v2106_v3, %v2106_v3  ;;  %v2139_v5 = vpack.c.bf16 %v2107_v39, %v2107_v39  ;;  %v2871_v3 = vld [vmem:[%s4478_s18] ss:$0 sm:$0xff] }
 0x2c3   : > { %v2133_v59 = vpack.c.bf16 %v2101_v6, %v2101_v6  ;;  %v2134_v56 = vpack.c.bf16 %v2102_v24, %v2102_v24  ;;  %v2140_v36 = vpack.c.bf16 %v2108_v18, %v2108_v18  ;;  %v2141_v37 = vpack.c.bf16 %v2109_v61, %v2109_v61 }
 0x2c4   : > { %v2135_v38 = vpack.c.bf16 %v2103_v50, %v2103_v50  ;;  %v2142_v15 = vpack.c.bf16 %v2110_v58, %v2110_v58  ;;  %v2204_v57 = vunpack.c.l.b16 %v2129_v31  ;;  %v2205_v1 = vunpack.c.l.b16 %v2130_v52 }
 0x2c5   : > { %v2136_v47 = vpack.c.bf16 %v2104_v17, %v2104_v17  ;;  %v2143_v51 = vpack.c.bf16 %v2111_v23, %v2111_v23  ;;  %v2144_v62 = vpack.c.bf16 %v2112_v25, %v2112_v25  ;;  %v2206_v20 = vunpack.c.l.b16 %v2131_v14 }
 0x2c6   : > { %v2207_v26 = vunpack.c.l.b16 %v2132_v54  ;;  %v2212_v4 = vunpack.c.l.b16 %v2137_v8  ;;  %v2213_v22 = vunpack.c.l.b16 %v2138_v60  ;;  %v2214_v16 = vunpack.c.l.b16 %v2139_v5 }
 0x2c7   : > { %v2208_v12 = vunpack.c.l.b16 %v2133_v59  ;;  %v2215_v53 = vunpack.c.l.b16 %v2140_v36  ;;  %v2216_v40 = vunpack.c.l.b16 %v2141_v37  ;;  %v2209_v13 = vunpack.c.l.b16 %v2134_v56 }
 0x2c8   : > { %v2217_v42 = vunpack.c.l.b16 %v2142_v15  ;;  %v2234_v63 = vsel %vm1535_vm11, %v2205_v1, %v2204_v57  ;;  %v2241_v48 = vsel %vm1535_vm11, %v2213_v22, %v2212_v4  ;;  %v2210_v44 = vunpack.c.l.b16 %v2135_v38 }
 0x2c9   : > { %v2218_v46 = vunpack.c.l.b16 %v2143_v51  ;;  %v2235_v11 = vsel %vm1537_vm12, %v2206_v20, %v2234_v63  ;;  %v2242_v19 = vsel %vm1537_vm12, %v2214_v16, %v2241_v48  ;;  %v2211_v32 = vunpack.c.l.b16 %v2136_v47 }
 0x2ca   : > { %v2219_v41 = vunpack.c.l.b16 %v2144_v62  ;;  %v2236_v27 = vsel %vm1539_vm13, %v2207_v26, %v2235_v11  ;;  %v2243_v55 = vsel %vm1539_vm13, %v2215_v53, %v2242_v19  ;;  %vm2342_vm6 = vcmask 519168  }
 0x2cb   : > { %v2237_v0 = vsel %vm1541_vm14, %v2208_v12, %v2236_v27  ;;  %v2244_v49 = vsel %vm1541_vm14, %v2216_v40, %v2243_v55 }
 0x2cc   : > { %v2238_v9 = vsel %vm1543_vm15, %v2209_v13, %v2237_v0  ;;  %v2245_v35 = vsel %vm1543_vm15, %v2217_v42, %v2244_v49 }
 0x2cd   : > { %v2239_v10 = vsel %vm1545_vm0, %v2210_v44, %v2238_v9  ;;  %v2246_v2 = vsel %vm1545_vm0, %v2218_v46, %v2245_v35 }
 0x2ce   : > { %v2240_v6 = vsel %vm1547_vm2, %v2211_v32, %v2239_v10  ;;  %v2247_v34 = vsel %vm1547_vm2, %v2219_v41, %v2246_v2 }
 0x2cf   : > { %v2249_v29 = vpack.c.b16 %v2247_v34, %v2240_v6 }
 0x2d1   : > { %3043 = vmatmul.mubr.msk.bf16.vlgmr.msra.gmra.mxu1 %vm706_vm1, %v2249_v29 }
 0x391   : > { %v3044_v39 = vpop.f32.mrf.mxu1 }
 0x392   : > { %v2311_v24 = vadd.f32 %v3044_v39, %v2871_v3 }
 0x393   : > { %v2302_v50 = vpop.f32.mrf.mxu1 }
 0x394   : > { %v2319_v18 = vadd.f32 %v2311_v24, %v4073_v7  ;;  %v2303_v61 = vadd.f32 %v2871_v3, %v2302_v50 }
 0x395   : > { %v3045_v21 = vpop.f32.mrf.mxu1 }
 0x396   : > { %v2921_v58 = vpack.c.bf16 %v2319_v18, %v2319_v18  ;;  %v2317_v31 = vadd.f32 %v2303_v61, %v4075_v33  ;;  %v2314_v52 = vadd.f32 %v3045_v21, %v2871_v3 }
 0x397   : > { %v2305_v17 = vpop.f32.mrf.mxu1 }
 0x398   : > { %2345 = vst.msk [vmem:[%s2341_s5 + $0x20] sm:$0xf] %vm2342_vm6, %v2921_v58  ;;  %v2919_v23 = vpack.c.bf16 %v2317_v31, %v2317_v31  ;;  %v2320_v14 = vadd.f32 %v2314_v52, %v4077_v45  ;;  %v2306_v54 = vadd.f32 %v2871_v3, %v2305_v17 }
 0x39a   : > { %2343 = vst.msk [vmem:[%s2341_s5] sm:$0xf] %vm2342_vm6, %v2919_v23  ;;  %v2922_v25 = vpack.c.bf16 %v2320_v14, %v2320_v14  ;;  %v2318_v7 = vadd.f32 %v2306_v54, %v4079_v43  ;;  %2350 = sbr.rel (%p2882_p11) target bundleno = 1393 (0x571), region = 166 }
 0x39c   : > { %2346 = vst.msk [vmem:[%s2341_s5 + $0x24] sm:$0xf] %vm2342_vm6, %v2922_v25  ;;  %v2920_v8 = vpack.c.bf16 %v2318_v7, %v2318_v7 }
 0x39e   : > { %2344 = vst.msk [vmem:[%s2341_s5 + $0x4] sm:$0xf] %vm2342_vm6, %v2920_v8 }
 0x39f   : > { %v2360_v33 = vld [vmem:[%s4479_s26 + $0x38] sm:$0xff]  ;;  %v3336_v60 = vmov 0.0   ;;  %v2359_v45 = vld [vmem:[%s4479_s26 + $0x30] sm:$0xff]  ;;  %vm3337_vm1 = vmmov 0   ;;  %v2358_v43 = vld [vmem:[%s4479_s26 + $0x28] sm:$0xff]  ;;  %vm2454_vm7 = vcmask 1043456  }
 0x3a0   : > { %3046 = vmatprep.subr.mxu0 %v3336_v60  ;;  %3062 = vmatprep.mubr.msk.f32.mxu0 %vm3337_vm1, %v3336_v60  ;;  %v2357_v5 = vld [vmem:[%s4479_s26 + $0x20] sm:$0xff]  ;;  %v2356_v59 = vld [vmem:[%s4479_s26 + $0x18] sm:$0xff]  ;;  %v2355_v56 = vld [vmem:[%s4479_s26 + $0x10] sm:$0xff]  ;;  %vm2450_vm8 = vcmask 31744  }
 0x3a1   : > { %3047 = vmatpush3.msra.mxu0 %v2360_v33  ;;  %3065 = vmatprep.subr.mxu1 %v3336_v60  ;;  %v2351_v36 = vld [vmem:[#allocation2] sm:$0x3]  ;;  %v2354_v37 = vld [vmem:[%s4479_s26 + $0x8] sm:$0xff] }
 0x3a2   : > { %3048 = vmatprep.subr.mxu0 %v3336_v60  ;;  %3067 = vmatprep.mubr.msk.f32.mxu1 %vm3337_vm1, %v3336_v60  ;;  %v2353_v38 = vld [vmem:[%s4479_s26] sm:$0xff]  ;;  %v2352_v15 = vmul.f32 0.015625, %v2351_v36 }
 0x3a3   : > { %3049 = vmatpush3.msra.mxu0 %v2359_v45  ;;  %v2442_v57 = vld [vmem:[%s4480_s20] sm:$0xf] }
 0x3a4   : > { %3050 = vmatprep.subr.mxu0 %v3336_v60  ;;  %3066 = vmatpush3.msk.msra.mxu1 %vm2454_vm7, %v2442_v57  ;;  %v2883_v1 = vld [vmem:[%s4481_s16] ss:$0 sm:$0xff] }
 0x3a5   : > { %3051 = vmatpush3.msra.mxu0 %v2358_v43  ;;  %v2885_v26 = vld [vmem:[%s4482_s9] ss:$0 sm:$0xff]  ;;  %v2942_v13 = vld [vmem:[%s4082_s13] sm:$0xff]   ;;  %v2974_v48 = vld [vmem:[%s4082_s13 + $0x10] sm:$0xff]  }
 0x3a6   : > { %3052 = vmatprep.subr.mxu0 %v3336_v60  ;;  %v2973_v42 = vld [vmem:[%s4082_s13 + $0x8] sm:$0xff]   ;;  %v2975_v44 = vld [vmem:[%s4082_s13 + $0x18] sm:$0xff]   ;;  %v2976_v46 = vld [vmem:[%s4082_s13 + $0x20] sm:$0xff]   ;;  %v2943_v19 = vunpack.c.l.bf16 %v2942_v13  ;;  %v2944_v32 = vunpack.c.h.bf16 %v2942_v13  ;;  %v2951_v0 = vunpack.c.l.bf16 %v2974_v48  ;;  %v2952_v49 = vunpack.c.h.bf16 %v2974_v48 }
 0x3a7   : > { %3053 = vmatpush3.msra.mxu0 %v2357_v5  ;;  %v2947_v41 = vunpack.c.l.bf16 %v2973_v42  ;;  %v2948_v27 = vunpack.c.h.bf16 %v2973_v42  ;;  %v2977_v55 = vld [vmem:[%s4082_s13 + $0x28] sm:$0xff]   ;;  %v2978_v9 = vld [vmem:[%s4082_s13 + $0x30] sm:$0xff]   ;;  %v2979_v35 = vld [vmem:[%s4082_s13 + $0x38] sm:$0xff]   ;;  %v2955_v6 = vunpack.c.l.bf16 %v2975_v44  ;;  %v2956_v34 = vunpack.c.h.bf16 %v2975_v44 }
 0x3a8   : > { %3054 = vmatprep.subr.mxu0 %v3336_v60  ;;  %v2959_v29 = vunpack.c.l.bf16 %v2976_v46  ;;  %v2960_v3 = vunpack.c.h.bf16 %v2976_v46  ;;  %v2963_v39 = vunpack.c.l.bf16 %v2977_v55  ;;  %v2964_v24 = vunpack.c.h.bf16 %v2977_v55 }
 0x3a9   : > { %3055 = vmatpush3.msra.mxu0 %v2356_v59  ;;  %v2967_v61 = vunpack.c.l.bf16 %v2978_v9  ;;  %v2968_v21 = vunpack.c.h.bf16 %v2978_v9  ;;  %v2971_v58 = vunpack.c.l.bf16 %v2979_v35  ;;  %v2972_v31 = vunpack.c.h.bf16 %v2979_v35 }
 0x3aa   : > { %3056 = vmatprep.subr.mxu0 %v3336_v60 }
 0x3ab   : > { %3057 = vmatpush3.msra.mxu0 %v2355_v56 }
 0x3ac   : > { %3058 = vmatprep.subr.mxu0 %v3336_v60 }
 0x3ad   : > { %3059 = vmatpush3.msra.mxu0 %v2354_v37 }
 0x3ae   : > { %3060 = vmatprep.subr.mxu0 %v3336_v60 }
 0x3af   : > { %3061 = vmatpush3.msra.mxu0 %v2353_v38 }
 0x3b0   : > { %3063 = vmatmul.mubr.msk.f32.vlgmr.msra.gmra.mxu0 %vm1646_vm4, %v2352_v15 }
 0x470   : > { %v2437_v47 = vpop.f32.mrf.mxu0 }
 0x471   : > { %v2438_v51 = vadd.f32 %v2883_v1, %v2437_v47 }
 0x472   : > { %v3064_v62 = vpop.f32.mrf.mxu0 }
 0x473   : > { %v2441_v20 = vmax.f32 %v2438_v51, 0.0 }
 0x475   : > { %3068 = vmatmul.mubr.msk.f32.vlgmr.msra.gmra.mxu1 %vm2450_vm8, %v2441_v20 }
 0x535   : > { %v2524_v4 = vpop.f32.mrf.mxu1 }
 0x536   : > { %v2525_v22 = vadd.f32 %v2885_v26, %v2524_v4 }
 0x537   : > { %v3069_v16 = vpop.f32.mrf.mxu1 }
 0x538   : > { %v2888_v12 = vmul.f32 -1.442695, %v2525_v22 }
 0x53a   : > { %3201 = vpow2.f32 %v2888_v12 }
 0x547   : > { %v3202_v53 = vpop.eup %3201 }
 0x548   : > { %v2531_v40 = vadd.f32 1.0, %v3202_v53 }
 0x54a   : > { %3203 = vrcp.f32 %v2531_v40 }
 0x557   : > { %v3204_v63 = vpop.eup %3203 }
 0x558   : > { %v2573_v11 = vrot.slane %v3204_v63, %v3623_v30 }
 0x55a   : > { %v2574_v10 = vcombine.high %v2573_v11, %v2573_v11  ;;  %v2581_v2 = vrot.slane %v2573_v11, %v3623_v30 }
 0x55c   : > { %v2588_v50 = vrot.slane %v2574_v10, %v3623_v30  ;;  %v2592_v18 = vrot.slane %v2581_v2, %v3618_v28 }
 0x55e   : > { %v2596_v52 = vrot.slane %v2588_v50, %v3618_v28  ;;  %v2599_v17 = vadd.f32 %v2943_v19, %v2592_v18  ;;  %v2600_v23 = vadd.f32 %v2944_v32, %v2592_v18  ;;  %v2601_v14 = vadd.f32 %v2947_v41, %v2592_v18 }
 0x55f   : > { %v2602_v54 = vadd.f32 %v2948_v27, %v2592_v18  ;;  %v2603_v25 = vadd.f32 %v2951_v0, %v2592_v18  ;;  %v2604_v7 = vadd.f32 %v2952_v49, %v2592_v18  ;;  %v2605_v8 = vadd.f32 %v2955_v6, %v2592_v18 }
 0x560   : > { %v2606_v33 = vadd.f32 %v2956_v34, %v2592_v18  ;;  %v2607_v60 = vadd.f32 %v2959_v29, %v2596_v52  ;;  %v2608_v45 = vadd.f32 %v2960_v3, %v2596_v52  ;;  %v2609_v43 = vadd.f32 %v2963_v39, %v2596_v52 }
 0x561   : > { %v2610_v30 = vadd.f32 %v2964_v24, %v2596_v52  ;;  %v2611_v5 = vadd.f32 %v2967_v61, %v2596_v52  ;;  %v2612_v59 = vadd.f32 %v2968_v21, %v2596_v52  ;;  %v2613_v56 = vadd.f32 %v2971_v58, %v2596_v52 }
 0x562   : > { %v2614_v36 = vadd.f32 %v2972_v31, %v2596_v52  ;;  %v2615_v37 = vmax.f32 %v2599_v17, 0.0  ;;  %v2616_v38 = vmax.f32 %v2600_v23, 0.0  ;;  %v2617_v15 = vmax.f32 %v2601_v14, 0.0 }
 0x563   : > { %v2618_v28 = vmax.f32 %v2602_v54, 0.0  ;;  %v2619_v57 = vmax.f32 %v2603_v25, 0.0  ;;  %v2620_v1 = vmax.f32 %v2604_v7, 0.0  ;;  %v2621_v47 = vmax.f32 %v2605_v8, 0.0 }
 0x564   : > { %v2622_v51 = vmax.f32 %v2606_v33, 0.0  ;;  %v2623_v62 = vmax.f32 %v2607_v60, 0.0  ;;  %v2624_v20 = vmax.f32 %v2608_v45, 0.0  ;;  %v2625_v26 = vmax.f32 %v2609_v43, 0.0 }
 0x565   : > { %v2626_v4 = vmax.f32 %v2610_v30, 0.0  ;;  %v2627_v22 = vmax.f32 %v2611_v5, 0.0  ;;  %v2628_v16 = vmax.f32 %v2612_v59, 0.0  ;;  %v2629_v12 = vmax.f32 %v2613_v56, 0.0 }
 0x566   : > { %v2630_v53 = vmax.f32 %v2614_v36, 0.0  ;;  %v2923_v40 = vpack.c.bf16 %v2615_v37, %v2615_v37  ;;  %v2924_v13 = vpack.c.bf16 %v2616_v38, %v2616_v38  ;;  %v2925_v42 = vpack.c.bf16 %v2617_v15, %v2617_v15 }
 0x567   : > { %v2926_v63 = vpack.c.bf16 %v2618_v28, %v2618_v28  ;;  %v2927_v48 = vpack.c.bf16 %v2619_v57, %v2619_v57  ;;  %v2928_v44 = vpack.c.bf16 %v2620_v1, %v2620_v1  ;;  %v2929_v46 = vpack.c.bf16 %v2621_v47, %v2621_v47 }
 0x568   : > { %v2930_v11 = vpack.c.bf16 %v2622_v51, %v2622_v51  ;;  %v2931_v19 = vpack.c.bf16 %v2623_v62, %v2623_v62  ;;  %v2932_v32 = vpack.c.bf16 %v2624_v20, %v2624_v20  ;;  %v2933_v41 = vpack.c.bf16 %v2625_v26, %v2625_v26  ;;  %2695 = vst.msk [vmem:[%s4082_s13] sm:$0xf] %vm2342_vm6, %v2923_v40 }
 0x569   : > { %2696 = vst.msk [vmem:[%s4082_s13 + $0x4] sm:$0xf] %vm2342_vm6, %v2924_v13  ;;  %2697 = vst.msk [vmem:[%s4082_s13 + $0x8] sm:$0xf] %vm2342_vm6, %v2925_v42  ;;  %v2934_v27 = vpack.c.bf16 %v2626_v4, %v2626_v4  ;;  %v2935_v55 = vpack.c.bf16 %v2627_v22, %v2627_v22  ;;  %v2936_v0 = vpack.c.bf16 %v2628_v16, %v2628_v16 }
 0x56a   : > { %v2937_v49 = vpack.c.bf16 %v2629_v12, %v2629_v12  ;;  %2698 = vst.msk [vmem:[%s4082_s13 + $0xc] sm:$0xf] %vm2342_vm6, %v2926_v63  ;;  %2699 = vst.msk [vmem:[%s4082_s13 + $0x10] sm:$0xf] %vm2342_vm6, %v2927_v48  ;;  %v2938_v9 = vpack.c.bf16 %v2630_v53, %v2630_v53 }
 0x56b   : > { %2700 = vst.msk [vmem:[%s4082_s13 + $0x14] sm:$0xf] %vm2342_vm6, %v2928_v44  ;;  %2701 = vst.msk [vmem:[%s4082_s13 + $0x18] sm:$0xf] %vm2342_vm6, %v2929_v46 }
 0x56c   : > { %2702 = vst.msk [vmem:[%s4082_s13 + $0x1c] sm:$0xf] %vm2342_vm6, %v2930_v11  ;;  %2703 = vst.msk [vmem:[%s4082_s13 + $0x20] sm:$0xf] %vm2342_vm6, %v2931_v19 }
 0x56d   : > { %2704 = vst.msk [vmem:[%s4082_s13 + $0x24] sm:$0xf] %vm2342_vm6, %v2932_v32  ;;  %2705 = vst.msk [vmem:[%s4082_s13 + $0x28] sm:$0xf] %vm2342_vm6, %v2933_v41 }
 0x56e   : > { %2706 = vst.msk [vmem:[%s4082_s13 + $0x2c] sm:$0xf] %vm2342_vm6, %v2934_v27  ;;  %2707 = vst.msk [vmem:[%s4082_s13 + $0x30] sm:$0xf] %vm2342_vm6, %v2935_v55 }
 0x56f   : > { %2708 = vst.msk [vmem:[%s4082_s13 + $0x34] sm:$0xf] %vm2342_vm6, %v2936_v0  ;;  %2709 = vst.msk [vmem:[%s4082_s13 + $0x38] sm:$0xf] %vm2342_vm6, %v2937_v49 }
 0x570   : > { %2710 = vst.msk [vmem:[%s4082_s13 + $0x3c] sm:$0xf] %vm2342_vm6, %v2938_v9 }
 0x571 PF: > { %s4483_s11 = sld [smem:[#allocation9_spill]]  ;;  %s2726_s18 = sshll.u32 %s4082_s13, 4  ;;  %s4349_s18 = int_to_ptr.vmem [resolvable:$true] %s2726_s18 }
 0x572   : > { %s4484_s21 = sld [smem:[#allocation24_spill]]  ;;  %s4353_s16 = scalar_lea.sflag [#allocation7], %s636_s7 }
 0x573   : > { %s3205_s12 = scalar_lea.vmem %s4349_s18, 1024  ;;  %s3338_s5 = smov [#allocation6]  }
 0x574   : > { %p3206_p12 = scmp.ne.s32.totalorder %s4349_s18, %s3205_s12  ;;  %s3209_s9 = sshll.u32 %s3338_s5, 4  ;;  %s3210_s9 = int_to_ptr.vmem [resolvable:$false] %s3209_s9 }
 0x575   : > { %p3212_p2 = scmp.lt.s32.totalorder %s4349_s18, %s3210_s9 }
 0x576   : > { %p3207_p13 = pnand %p3206_p12, %p3529_p0 }
 0x577   : > { %s2940_s10 = sshll.u32 %s4483_s11, 10  ;;  %s3211_s11 = scalar_lea.vmem %s3210_s9, 2048 }
 0x578   : > { %s4485_s25 = smov %s4484_s21  ;;  %s4346_s20 = scalar_lea.hbm %s4484_s21, %s2940_s10 }
 0x579   : > { %p3208_p1 = pneg %p3207_p13  ;;  %p3213_p5 = scmp.lt.s32.totalorder %s3211_s11, %s3205_s12 }
 0x57b   : > { %p3214_p3 = por %p3213_p5, %p3212_p2 }
 0x57d   : > { %p3215_p6 = pnand %p3214_p3, %p3208_p1 }
 0x57f   : > { %3218 = shalt.err (!%p3215_p6)
}
 0x580   : > { %s3219_s7 = scalar_lea.hbm %s4346_s20, 1024  ;;  %s3223_s27 = scalar_lea.hbm %s4485_s25, 2048 }
 0x581   : > { %p3220_p7 = scmp.ne.s32.totalorder %s4346_s20, %s3219_s7  ;;  %p3224_p10 = scmp.lt.s32.totalorder %s4346_s20, %s4485_s25 }
 0x582   : > { %p3225_p11 = scmp.lt.s32.totalorder %s3223_s27, %s3219_s7 }
 0x583   : > { %p3221_p8 = pnand %p3220_p7, %p3529_p0 }
 0x584   : > { %p3226_p12 = por %p3225_p11, %p3224_p10 }
 0x585   : > { %p3222_p9 = pneg %p3221_p8 }
 0x587   : > { %p3227_p13 = pnand %p3226_p12, %p3222_p9 }
 0x589   : > { %3230 = shalt.err (!%p3227_p13)
}
 0x58a   : > { %s3339_s12 = smov 64   ;;  %s3340_s5 = smov 4  }
 0x58b   : > { %3074 = dma.vmem_to_hbm [thread:$0]  (%p3529_p0), %s4349_s18, 1024, %s4346_s20, %s4353_s16, %s3339_s12, %s3339_s12, %s3340_s5  }
 0x58c PF: > { %p3080_p1 = scmp.ge.s32.totalorder %s3329_s24, 2  ;;  %s2741_s9 = sand.u32 1, %s3285_s29  }
 0x58d   : > { %s2742_s11 = scalar_lea.sflag [#allocation7], %s2741_s9 }
 0x58e   : > { %p3077_p2 = pnand %p3080_p1, %p3537_p4 }
 0x590   : > { %p3078_p5 = pneg %p3077_p2 }
 0x592   : > { %3280 = dma.done.wait (%p3078_p5), %s2742_s11, 1024  }
 0x593   : > { %3282 = vsyncadd (%p3078_p5), %s2742_s11, 4294966272  ;;  %s27_s24 = sadd.s32 1, %s3329_s24   ;;  %s4486_s7 = sld [smem:[#allocation13_spill]] }
 0x594   : > { %p24_p3 = scmp.ge.s32.totalorder %s27_s24, 10   ;;  %s4487_s14 = sld [smem:[#allocation14_spill]] }
 0x595   : > { %s4488_s20 = sld [smem:[#allocation12_spill]]  ;;  %s4491_s29 = smov %s3289_s30 }
 0x596   : > { %s4489_s13 = sld [smem:[#allocation10_spill]]  ;;  %s4492_s30 = smov %s3293_s15 }
 0x597   : > { %s4490_s10 = sld [smem:[#allocation11_spill]]  ;;  %s4494_s16 = smov %s3301_s17 }
 0x598   : > { %s4496_s18 = smov %s3309_s19  ;;  %s4499_s21 = smov %s3325_s23 }
 0x599   : > { %s4493_s15 = smov %s4486_s7  ;;  %26 = sbr.rel (!%p24_p3) target bundleno = 18 (0x12), region = 215 }
 0x59a   : > { %s4495_s17 = smov %s4487_s14 }
 0x59b   : > { %s4497_s19 = smov %s4488_s20  ;;  %s4498_s20 = smov %s3321_s22 }
 0x59c   : > { %s4500_s22 = smov %s4489_s13 }
 0x59d   : > { %s4501_s23 = smov %s4490_s10 }
 0x59e   :  { %2747 = vsyncpa [#allocation7], 1 }
 0x59f   :  { %2749 = vsyncpa [#allocation7 + $0x1], 1 }

</bundles_post_ra>
